<compile_context>
chip_gen: v6e
topology: v6e:2x2x1
jax: 0.10.0
libtpu: 0.0.40
codegen_flags: <defaults>
</compile_context>

<pallas_src>
import jax
import jax.numpy as jnp
import numpy as np
from jax import lax
from jax.experimental import pallas as pl
from jax.experimental.pallas import tpu as pltpu

EPS = 1e-5  # nn.BatchNorm2d default eps


def _toeplitz_weight(w_hwio, W):
    """Fold the kx tap and Cin into the matmul contraction dim.

    w_hwio: (3, 3, Cin, Cout) conv weight.
    Returns M of shape (3, (W+2)*Cin, W*Cout) with
        M[ky][(w+kx)*Cin + c, w*Cout + co] = w_hwio[ky, kx, c, co]
    so that, with a width-padded input row laid out as x[.., w'*Cin + c],
    one dot per ky computes the full conv for that row.
    """
    kh, kw, cin, cout = w_hwio.shape
    mats = []
    for ky in range(kh):
        m = jnp.zeros(((W + 2) * cin, W * cout), w_hwio.dtype)
        for kx in range(kw):
            band = jnp.eye(W + 2, W, k=-kx, dtype=w_hwio.dtype)  # band[w+kx, w] = 1
            m = m + jnp.einsum("pq,co->pcqo", band, w_hwio[ky, kx]).reshape(
                (W + 2) * cin, W * cout)
        mats.append(m)
    return jnp.stack(mats, axis=0)


def _make_bridge_kernel(N, H, W, C1, C2):
    """Fused (Conv3x3 -> BN(train) -> ReLU) x 2 on VMEM-resident tiles."""
    lane = W * C2
    inv_cnt = 1.0 / float(N * H * W)
    # Circular-roll fold distances that sum each channel's W lane groups.
    shifts = []
    s = lane // 2
    while s >= C2:
        shifts.append(s)
        s //= 2

    def pad_image_borders(x2d, cin):
        # (N*H, W*cin) -> (N*(H+2), (W+2)*cin) with a zero ring per image.
        zc = jnp.zeros((N * H, cin), jnp.float32)
        xw = jnp.concatenate([zc, x2d, zc], axis=1)          # width pad
        zr = jnp.zeros((1, (W + 2) * cin), jnp.float32)
        parts = []
        for n in range(N):
            parts.extend([zr, xw[n * H:(n + 1) * H, :], zr])  # height pad
        return jnp.concatenate(parts, axis=0)

    def conv_bn_relu(x2d, cin, m_ref, g_row, be_row):
        xp = pad_image_borders(x2d, cin)
        # 3x3 conv == 3 MXU dots per image (ky taps); kx & cin folded into K.
        per_image = []
        for n in range(N):
            base = n * (H + 2)
            r = jnp.zeros((H, lane), jnp.float32)
            for ky in range(3):
                lhs = xp[base + ky:base + ky + H, :]          # (H, (W+2)*cin)
                r = r + jnp.dot(lhs, m_ref[ky],
                                preferred_element_type=jnp.float32)
            per_image.append(r)
        acc = per_image[0] if N == 1 else jnp.concatenate(per_image, axis=0)

        # Training-mode BN, one pass: per-channel sum & sum of squares.
        col_sum = jnp.sum(acc, axis=0, keepdims=True)         # (1, W*C2)
        col_sq = jnp.sum(acc * acc, axis=0, keepdims=True)    # (1, W*C2)
        # Fold the W lane groups so every lane holds its channel's total.
        for sh in shifts:
            col_sum = col_sum + pltpu.roll(col_sum, sh, 1)
            col_sq = col_sq + pltpu.roll(col_sq, sh, 1)
        mean = col_sum * inv_cnt
        var = col_sq * inv_cnt - mean * mean
        scale = g_row * lax.rsqrt(var + EPS)                  # (1, W*C2)
        shift = be_row - mean * scale
        return jnp.maximum(acc * scale + shift, 0.0)          # fused BN + ReLU

    def kernel(x_ref, m1_ref, m2_ref, g1_ref, be1_ref, g2_ref, be2_ref, o_ref):
        h1 = conv_bn_relu(x_ref[...], C1, m1_ref, g1_ref[...], be1_ref[...])
        o_ref[...] = conv_bn_relu(h1, C2, m2_ref, g2_ref[...], be2_ref[...])

    return kernel


def bridge_forward(x_nchw, params):
    """Bridge.forward. Input/output are NCHW (PyTorch layout)."""
    (w1, _b1, g1, be1), (w2, _b2, g2, be2) = params  # conv biases cancelled by BN
    N, C1, H, W = x_nchw.shape
    C2 = w1.shape[-1]
    assert W & (W - 1) == 0, "lane-group fold assumes W is a power of two"

    # NCHW -> lane-friendly 2D layout (N*H, W*C): channel fastest along lanes.
    x2d = jnp.transpose(x_nchw, (0, 2, 3, 1)).reshape(N * H, W * C1)
    m1 = _toeplitz_weight(w1, W)                       # (3, (W+2)*C1, W*C2)
    m2 = _toeplitz_weight(w2, W)                       # (3, (W+2)*C2, W*C2)
    g1r = jnp.tile(g1, W)[None, :]                     # (1, W*C2)
    be1r = jnp.tile(be1, W)[None, :]
    g2r = jnp.tile(g2, W)[None, :]
    be2r = jnp.tile(be2, W)[None, :]

    vmem = pl.BlockSpec(memory_space=pltpu.MemorySpace.VMEM)
    # TODO(synk): for production bridge channel counts (C>=128), add a spatial
    # grid + two-phase BN reduction sized to v7x's 64 MiB VMEM; at these demo
    # shapes everything (<1 MiB) fits a single VMEM-resident block.
    out2d = pl.pallas_call(
        _make_bridge_kernel(N, H, W, C1, C2),
        out_shape=jax.ShapeDtypeStruct((N * H, W * C2), jnp.float32),
        in_specs=[vmem] * 7,
        out_specs=vmem,
    )(x2d, m1, m2, g1r, be1r, g2r, be2r)

    out = out2d.reshape(N, H, W, C2)
    return jnp.transpose(out, (0, 3, 1, 2))            # NHWC -> NCHW


# ---------------- pure-JAX reference (for correctness check) ----------------
def ref_conv_block(x_nhwc, w_hwio, b, gamma, beta):
    y = lax.conv_general_dilated(
        x_nhwc, w_hwio, window_strides=(1, 1), padding=((1, 1), (1, 1)),
        dimension_numbers=("NHWC", "HWIO", "NHWC"))
    y = y + b[None, None, None, :]
    mean = jnp.mean(y, axis=(0, 1, 2), keepdims=True)
    var = jnp.mean((y - mean) ** 2, axis=(0, 1, 2), keepdims=True)
    y = (y - mean) * lax.rsqrt(var + EPS) * gamma + beta
    return jnp.maximum(y, 0.0)


def ref_bridge(x_nchw, params):
    x = jnp.transpose(x_nchw, (0, 2, 3, 1))
    for (w, b, g, be) in params:
        x = ref_conv_block(x, w, b, g, be)
    return jnp.transpose(x, (0, 3, 1, 2))


if __name__ == "__main__":
    key = jax.random.PRNGKey(0)
    N, Cin, Cout, H, W = 2, 4, 8, 16, 16

    ks = jax.random.split(key, 9)
    x = jax.random.normal(ks[0], (N, Cin, H, W), jnp.float32)  # NCHW like PyTorch

    # ConvBlock 1: Cin -> Cout
    w1 = 0.2 * jax.random.normal(ks[1], (3, 3, Cin, Cout), jnp.float32)
    b1 = 0.1 * jax.random.normal(ks[2], (Cout,), jnp.float32)
    g1 = 1.0 + 0.1 * jax.random.normal(ks[3], (Cout,), jnp.float32)
    be1 = 0.05 * jax.random.normal(ks[4], (Cout,), jnp.float32)
    # ConvBlock 2: Cout -> Cout
    w2 = 0.2 * jax.random.normal(ks[5], (3, 3, Cout, Cout), jnp.float32)
    b2 = 0.1 * jax.random.normal(ks[6], (Cout,), jnp.float32)
    g2 = 1.0 + 0.1 * jax.random.normal(ks[7], (Cout,), jnp.float32)
    be2 = 0.05 * jax.random.normal(ks[8], (Cout,), jnp.float32)

    params = ((w1, b1, g1, be1), (w2, b2, g2, be2))

    bridge_jit = jax.jit(bridge_forward)
    out = jax.block_until_ready(bridge_jit(x, params))
    ref = jax.block_until_ready(ref_bridge(x, params))

    assert out.shape == (N, Cout, H, W), out.shape
    np.testing.assert_allclose(np.asarray(out), np.asarray(ref),
                               rtol=1e-4, atol=1e-4)
    print("KERNEL_OK")
</pallas_src>

<mosaic_0001>
module attributes {stable_mosaic.version = 11 : i64} {
  func.func @kernel(%arg0: memref<32x64xf32, #tpu.memory_space<vmem>>, %arg1: memref<3x72x128xf32, #tpu.memory_space<vmem>>, %arg2: memref<3x144x128xf32, #tpu.memory_space<vmem>>, %arg3: memref<1x128xf32, #tpu.memory_space<vmem>>, %arg4: memref<1x128xf32, #tpu.memory_space<vmem>>, %arg5: memref<1x128xf32, #tpu.memory_space<vmem>>, %arg6: memref<1x128xf32, #tpu.memory_space<vmem>>, %arg7: memref<32x128xf32, #tpu.memory_space<vmem>>) attributes {dimension_semantics = [], scalar_prefetch = 0 : i64, scratch_operands = 0 : i64, tpu.core_type = #tpu.core_type<tc>} {
    %c0 = arith.constant 0 : index
    %c0_0 = arith.constant 0 : index
    %0 = vector.load %arg0[%c0, %c0_0] : memref<32x64xf32, #tpu.memory_space<vmem>>, vector<32x64xf32>
    %c0_1 = arith.constant 0 : index
    %c0_2 = arith.constant 0 : index
    %1 = vector.load %arg3[%c0_1, %c0_2] : memref<1x128xf32, #tpu.memory_space<vmem>>, vector<1x128xf32>
    %c0_3 = arith.constant 0 : index
    %c0_4 = arith.constant 0 : index
    %2 = vector.load %arg4[%c0_3, %c0_4] : memref<1x128xf32, #tpu.memory_space<vmem>>, vector<1x128xf32>
    %cst = arith.constant 0.000000e+00 : f32
    %3 = vector.broadcast %cst : f32 to vector<32x4xf32>
    %4 = tpu.concatenate %3, %0, %3 in 1 : vector<32x4xf32>, vector<32x64xf32>, vector<32x4xf32> -> vector<32x72xf32>
    %cst_5 = arith.constant 0.000000e+00 : f32
    %5 = vector.broadcast %cst_5 : f32 to vector<1x72xf32>
    %6 = vector.extract_strided_slice %4 {offsets = [0, 0], sizes = [16, 72], strides = [1, 1]} : vector<32x72xf32> to vector<16x72xf32>
    %7 = vector.extract_strided_slice %4 {offsets = [16, 0], sizes = [16, 72], strides = [1, 1]} : vector<32x72xf32> to vector<16x72xf32>
    %8 = tpu.concatenate %5, %6, %5, %5, %7, %5 in 0 : vector<1x72xf32>, vector<16x72xf32>, vector<1x72xf32>, vector<1x72xf32>, vector<16x72xf32>, vector<1x72xf32> -> vector<36x72xf32>
    %cst_6 = arith.constant 0.000000e+00 : f32
    %9 = vector.broadcast %cst_6 : f32 to vector<16x128xf32>
    %10 = vector.extract_strided_slice %8 {offsets = [0, 0], sizes = [16, 72], strides = [1, 1]} : vector<36x72xf32> to vector<16x72xf32>
    %c0_7 = arith.constant 0 : index
    %c0_8 = arith.constant 0 : index
    %c0_9 = arith.constant 0 : index
    %11 = vector.load %arg1[%c0_7, %c0_8, %c0_9] : memref<3x72x128xf32, #tpu.memory_space<vmem>>, vector<1x72x128xf32>
    %12 = vector.shape_cast %11 : vector<1x72x128xf32> to vector<72x128xf32>
    %cst_10 = arith.constant dense<0.000000e+00> : vector<16x128xf32>
    %13 = tpu.matmul %10, %12, %cst_10 {dimension_numbers = #tpu.dot_dimension_numbers<[1], [0], [0], [1], [0, 0, 1, 1], [], []>} : vector<16x72xf32>, vector<72x128xf32>, vector<16x128xf32> -> vector<16x128xf32>
    %14 = arith.addf %9, %13 : vector<16x128xf32>
    %15 = vector.extract_strided_slice %8 {offsets = [1, 0], sizes = [16, 72], strides = [1, 1]} : vector<36x72xf32> to vector<16x72xf32>
    %c1 = arith.constant 1 : index
    %c0_11 = arith.constant 0 : index
    %c0_12 = arith.constant 0 : index
    %16 = vector.load %arg1[%c1, %c0_11, %c0_12] : memref<3x72x128xf32, #tpu.memory_space<vmem>>, vector<1x72x128xf32>
    %17 = vector.shape_cast %16 : vector<1x72x128xf32> to vector<72x128xf32>
    %cst_13 = arith.constant dense<0.000000e+00> : vector<16x128xf32>
    %18 = tpu.matmul %15, %17, %cst_13 {dimension_numbers = #tpu.dot_dimension_numbers<[1], [0], [0], [1], [0, 0, 1, 1], [], []>} : vector<16x72xf32>, vector<72x128xf32>, vector<16x128xf32> -> vector<16x128xf32>
    %19 = arith.addf %14, %18 : vector<16x128xf32>
    %20 = vector.extract_strided_slice %8 {offsets = [2, 0], sizes = [16, 72], strides = [1, 1]} : vector<36x72xf32> to vector<16x72xf32>
    %c2 = arith.constant 2 : index
    %c0_14 = arith.constant 0 : index
    %c0_15 = arith.constant 0 : index
    %21 = vector.load %arg1[%c2, %c0_14, %c0_15] : memref<3x72x128xf32, #tpu.memory_space<vmem>>, vector<1x72x128xf32>
    %22 = vector.shape_cast %21 : vector<1x72x128xf32> to vector<72x128xf32>
    %cst_16 = arith.constant dense<0.000000e+00> : vector<16x128xf32>
    %23 = tpu.matmul %20, %22, %cst_16 {dimension_numbers = #tpu.dot_dimension_numbers<[1], [0], [0], [1], [0, 0, 1, 1], [], []>} : vector<16x72xf32>, vector<72x128xf32>, vector<16x128xf32> -> vector<16x128xf32>
    %24 = arith.addf %19, %23 : vector<16x128xf32>
    %cst_17 = arith.constant 0.000000e+00 : f32
    %25 = vector.broadcast %cst_17 : f32 to vector<16x128xf32>
    %26 = vector.extract_strided_slice %8 {offsets = [18, 0], sizes = [16, 72], strides = [1, 1]} : vector<36x72xf32> to vector<16x72xf32>
    %c0_18 = arith.constant 0 : index
    %c0_19 = arith.constant 0 : index
    %c0_20 = arith.constant 0 : index
    %27 = vector.load %arg1[%c0_18, %c0_19, %c0_20] : memref<3x72x128xf32, #tpu.memory_space<vmem>>, vector<1x72x128xf32>
    %28 = vector.shape_cast %27 : vector<1x72x128xf32> to vector<72x128xf32>
    %cst_21 = arith.constant dense<0.000000e+00> : vector<16x128xf32>
    %29 = tpu.matmul %26, %28, %cst_21 {dimension_numbers = #tpu.dot_dimension_numbers<[1], [0], [0], [1], [0, 0, 1, 1], [], []>} : vector<16x72xf32>, vector<72x128xf32>, vector<16x128xf32> -> vector<16x128xf32>
    %30 = arith.addf %25, %29 : vector<16x128xf32>
    %31 = vector.extract_strided_slice %8 {offsets = [19, 0], sizes = [16, 72], strides = [1, 1]} : vector<36x72xf32> to vector<16x72xf32>
    %c1_22 = arith.constant 1 : index
    %c0_23 = arith.constant 0 : index
    %c0_24 = arith.constant 0 : index
    %32 = vector.load %arg1[%c1_22, %c0_23, %c0_24] : memref<3x72x128xf32, #tpu.memory_space<vmem>>, vector<1x72x128xf32>
    %33 = vector.shape_cast %32 : vector<1x72x128xf32> to vector<72x128xf32>
    %cst_25 = arith.constant dense<0.000000e+00> : vector<16x128xf32>
    %34 = tpu.matmul %31, %33, %cst_25 {dimension_numbers = #tpu.dot_dimension_numbers<[1], [0], [0], [1], [0, 0, 1, 1], [], []>} : vector<16x72xf32>, vector<72x128xf32>, vector<16x128xf32> -> vector<16x128xf32>
    %35 = arith.addf %30, %34 : vector<16x128xf32>
    %36 = vector.extract_strided_slice %8 {offsets = [20, 0], sizes = [16, 72], strides = [1, 1]} : vector<36x72xf32> to vector<16x72xf32>
    %c2_26 = arith.constant 2 : index
    %c0_27 = arith.constant 0 : index
    %c0_28 = arith.constant 0 : index
    %37 = vector.load %arg1[%c2_26, %c0_27, %c0_28] : memref<3x72x128xf32, #tpu.memory_space<vmem>>, vector<1x72x128xf32>
    %38 = vector.shape_cast %37 : vector<1x72x128xf32> to vector<72x128xf32>
    %cst_29 = arith.constant dense<0.000000e+00> : vector<16x128xf32>
    %39 = tpu.matmul %36, %38, %cst_29 {dimension_numbers = #tpu.dot_dimension_numbers<[1], [0], [0], [1], [0, 0, 1, 1], [], []>} : vector<16x72xf32>, vector<72x128xf32>, vector<16x128xf32> -> vector<16x128xf32>
    %40 = arith.addf %35, %39 : vector<16x128xf32>
    %41 = tpu.concatenate %24, %40 in 0 : vector<16x128xf32>, vector<16x128xf32> -> vector<32x128xf32>
    %cst_30 = arith.constant dense<0.000000e+00> : vector<128xf32>
    %42 = vector.multi_reduction <add>, %41, %cst_30 [0] : vector<32x128xf32> to vector<128xf32>
    %43 = vector.shape_cast %42 : vector<128xf32> to vector<1x128xf32>
    %44 = arith.mulf %41, %41 : vector<32x128xf32>
    %cst_31 = arith.constant dense<0.000000e+00> : vector<128xf32>
    %45 = vector.multi_reduction <add>, %44, %cst_31 [0] : vector<32x128xf32> to vector<128xf32>
    %46 = vector.shape_cast %45 : vector<128xf32> to vector<1x128xf32>
    %c64_i32 = arith.constant 64 : i32
    %47 = tpu.dynamic_rotate %43 by %c64_i32 dim 1 : vector<1x128xf32>, i32 -> vector<1x128xf32>
    %48 = arith.addf %43, %47 : vector<1x128xf32>
    %c64_i32_32 = arith.constant 64 : i32
    %49 = tpu.dynamic_rotate %46 by %c64_i32_32 dim 1 : vector<1x128xf32>, i32 -> vector<1x128xf32>
    %50 = arith.addf %46, %49 : vector<1x128xf32>
    %c32_i32 = arith.constant 32 : i32
    %51 = tpu.dynamic_rotate %48 by %c32_i32 dim 1 : vector<1x128xf32>, i32 -> vector<1x128xf32>
    %52 = arith.addf %48, %51 : vector<1x128xf32>
    %c32_i32_33 = arith.constant 32 : i32
    %53 = tpu.dynamic_rotate %50 by %c32_i32_33 dim 1 : vector<1x128xf32>, i32 -> vector<1x128xf32>
    %54 = arith.addf %50, %53 : vector<1x128xf32>
    %c16_i32 = arith.constant 16 : i32
    %55 = tpu.dynamic_rotate %52 by %c16_i32 dim 1 : vector<1x128xf32>, i32 -> vector<1x128xf32>
    %56 = arith.addf %52, %55 : vector<1x128xf32>
    %c16_i32_34 = arith.constant 16 : i32
    %57 = tpu.dynamic_rotate %54 by %c16_i32_34 dim 1 : vector<1x128xf32>, i32 -> vector<1x128xf32>
    %58 = arith.addf %54, %57 : vector<1x128xf32>
    %c8_i32 = arith.constant 8 : i32
    %59 = tpu.dynamic_rotate %56 by %c8_i32 dim 1 : vector<1x128xf32>, i32 -> vector<1x128xf32>
    %60 = arith.addf %56, %59 : vector<1x128xf32>
    %c8_i32_35 = arith.constant 8 : i32
    %61 = tpu.dynamic_rotate %58 by %c8_i32_35 dim 1 : vector<1x128xf32>, i32 -> vector<1x128xf32>
    %62 = arith.addf %58, %61 : vector<1x128xf32>
    %cst_36 = arith.constant 0.001953125 : f32
    %63 = vector.broadcast %cst_36 : f32 to vector<1x128xf32>
    %64 = arith.mulf %60, %63 : vector<1x128xf32>
    %cst_37 = arith.constant 0.001953125 : f32
    %65 = vector.broadcast %cst_37 : f32 to vector<1x128xf32>
    %66 = arith.mulf %62, %65 : vector<1x128xf32>
    %67 = arith.mulf %64, %64 : vector<1x128xf32>
    %68 = arith.subf %66, %67 : vector<1x128xf32>
    %cst_38 = arith.constant 9.99999974E-6 : f32
    %69 = vector.broadcast %cst_38 : f32 to vector<1x128xf32>
    %70 = arith.addf %68, %69 : vector<1x128xf32>
    %71 = math.rsqrt %70 : vector<1x128xf32>
    %72 = arith.mulf %1, %71 : vector<1x128xf32>
    %73 = arith.mulf %64, %72 : vector<1x128xf32>
    %74 = arith.subf %2, %73 : vector<1x128xf32>
    %75 = vector.broadcast %72 : vector<1x128xf32> to vector<32x128xf32>
    %76 = arith.mulf %41, %75 : vector<32x128xf32>
    %77 = vector.broadcast %74 : vector<1x128xf32> to vector<32x128xf32>
    %78 = arith.addf %76, %77 : vector<32x128xf32>
    %cst_39 = arith.constant 0.000000e+00 : f32
    %79 = vector.broadcast %cst_39 : f32 to vector<32x128xf32>
    %80 = arith.maximumf %78, %79 : vector<32x128xf32>
    %c0_40 = arith.constant 0 : index
    %c0_41 = arith.constant 0 : index
    %81 = vector.load %arg5[%c0_40, %c0_41] : memref<1x128xf32, #tpu.memory_space<vmem>>, vector<1x128xf32>
    %c0_42 = arith.constant 0 : index
    %c0_43 = arith.constant 0 : index
    %82 = vector.load %arg6[%c0_42, %c0_43] : memref<1x128xf32, #tpu.memory_space<vmem>>, vector<1x128xf32>
    %cst_44 = arith.constant 0.000000e+00 : f32
    %83 = vector.broadcast %cst_44 : f32 to vector<32x8xf32>
    %84 = tpu.concatenate %83, %80, %83 in 1 : vector<32x8xf32>, vector<32x128xf32>, vector<32x8xf32> -> vector<32x144xf32>
    %cst_45 = arith.constant 0.000000e+00 : f32
    %85 = vector.broadcast %cst_45 : f32 to vector<1x144xf32>
    %86 = vector.extract_strided_slice %84 {offsets = [0, 0], sizes = [16, 144], strides = [1, 1]} : vector<32x144xf32> to vector<16x144xf32>
    %87 = vector.extract_strided_slice %84 {offsets = [16, 0], sizes = [16, 144], strides = [1, 1]} : vector<32x144xf32> to vector<16x144xf32>
    %88 = tpu.concatenate %85, %86, %85, %85, %87, %85 in 0 : vector<1x144xf32>, vector<16x144xf32>, vector<1x144xf32>, vector<1x144xf32>, vector<16x144xf32>, vector<1x144xf32> -> vector<36x144xf32>
    %cst_46 = arith.constant 0.000000e+00 : f32
    %89 = vector.broadcast %cst_46 : f32 to vector<16x128xf32>
    %90 = vector.extract_strided_slice %88 {offsets = [0, 0], sizes = [16, 144], strides = [1, 1]} : vector<36x144xf32> to vector<16x144xf32>
    %c0_47 = arith.constant 0 : index
    %c0_48 = arith.constant 0 : index
    %c0_49 = arith.constant 0 : index
    %91 = vector.load %arg2[%c0_47, %c0_48, %c0_49] : memref<3x144x128xf32, #tpu.memory_space<vmem>>, vector<1x144x128xf32>
    %92 = vector.shape_cast %91 : vector<1x144x128xf32> to vector<144x128xf32>
    %cst_50 = arith.constant dense<0.000000e+00> : vector<16x128xf32>
    %93 = tpu.matmul %90, %92, %cst_50 {dimension_numbers = #tpu.dot_dimension_numbers<[1], [0], [0], [1], [0, 0, 1, 1], [], []>} : vector<16x144xf32>, vector<144x128xf32>, vector<16x128xf32> -> vector<16x128xf32>
    %94 = arith.addf %89, %93 : vector<16x128xf32>
    %95 = vector.extract_strided_slice %88 {offsets = [1, 0], sizes = [16, 144], strides = [1, 1]} : vector<36x144xf32> to vector<16x144xf32>
    %c1_51 = arith.constant 1 : index
    %c0_52 = arith.constant 0 : index
    %c0_53 = arith.constant 0 : index
    %96 = vector.load %arg2[%c1_51, %c0_52, %c0_53] : memref<3x144x128xf32, #tpu.memory_space<vmem>>, vector<1x144x128xf32>
    %97 = vector.shape_cast %96 : vector<1x144x128xf32> to vector<144x128xf32>
    %cst_54 = arith.constant dense<0.000000e+00> : vector<16x128xf32>
    %98 = tpu.matmul %95, %97, %cst_54 {dimension_numbers = #tpu.dot_dimension_numbers<[1], [0], [0], [1], [0, 0, 1, 1], [], []>} : vector<16x144xf32>, vector<144x128xf32>, vector<16x128xf32> -> vector<16x128xf32>
    %99 = arith.addf %94, %98 : vector<16x128xf32>
    %100 = vector.extract_strided_slice %88 {offsets = [2, 0], sizes = [16, 144], strides = [1, 1]} : vector<36x144xf32> to vector<16x144xf32>
    %c2_55 = arith.constant 2 : index
    %c0_56 = arith.constant 0 : index
    %c0_57 = arith.constant 0 : index
    %101 = vector.load %arg2[%c2_55, %c0_56, %c0_57] : memref<3x144x128xf32, #tpu.memory_space<vmem>>, vector<1x144x128xf32>
    %102 = vector.shape_cast %101 : vector<1x144x128xf32> to vector<144x128xf32>
    %cst_58 = arith.constant dense<0.000000e+00> : vector<16x128xf32>
    %103 = tpu.matmul %100, %102, %cst_58 {dimension_numbers = #tpu.dot_dimension_numbers<[1], [0], [0], [1], [0, 0, 1, 1], [], []>} : vector<16x144xf32>, vector<144x128xf32>, vector<16x128xf32> -> vector<16x128xf32>
    %104 = arith.addf %99, %103 : vector<16x128xf32>
    %cst_59 = arith.constant 0.000000e+00 : f32
    %105 = vector.broadcast %cst_59 : f32 to vector<16x128xf32>
    %106 = vector.extract_strided_slice %88 {offsets = [18, 0], sizes = [16, 144], strides = [1, 1]} : vector<36x144xf32> to vector<16x144xf32>
    %c0_60 = arith.constant 0 : index
    %c0_61 = arith.constant 0 : index
    %c0_62 = arith.constant 0 : index
    %107 = vector.load %arg2[%c0_60, %c0_61, %c0_62] : memref<3x144x128xf32, #tpu.memory_space<vmem>>, vector<1x144x128xf32>
    %108 = vector.shape_cast %107 : vector<1x144x128xf32> to vector<144x128xf32>
    %cst_63 = arith.constant dense<0.000000e+00> : vector<16x128xf32>
    %109 = tpu.matmul %106, %108, %cst_63 {dimension_numbers = #tpu.dot_dimension_numbers<[1], [0], [0], [1], [0, 0, 1, 1], [], []>} : vector<16x144xf32>, vector<144x128xf32>, vector<16x128xf32> -> vector<16x128xf32>
    %110 = arith.addf %105, %109 : vector<16x128xf32>
    %111 = vector.extract_strided_slice %88 {offsets = [19, 0], sizes = [16, 144], strides = [1, 1]} : vector<36x144xf32> to vector<16x144xf32>
    %c1_64 = arith.constant 1 : index
    %c0_65 = arith.constant 0 : index
    %c0_66 = arith.constant 0 : index
    %112 = vector.load %arg2[%c1_64, %c0_65, %c0_66] : memref<3x144x128xf32, #tpu.memory_space<vmem>>, vector<1x144x128xf32>
    %113 = vector.shape_cast %112 : vector<1x144x128xf32> to vector<144x128xf32>
    %cst_67 = arith.constant dense<0.000000e+00> : vector<16x128xf32>
    %114 = tpu.matmul %111, %113, %cst_67 {dimension_numbers = #tpu.dot_dimension_numbers<[1], [0], [0], [1], [0, 0, 1, 1], [], []>} : vector<16x144xf32>, vector<144x128xf32>, vector<16x128xf32> -> vector<16x128xf32>
    %115 = arith.addf %110, %114 : vector<16x128xf32>
    %116 = vector.extract_strided_slice %88 {offsets = [20, 0], sizes = [16, 144], strides = [1, 1]} : vector<36x144xf32> to vector<16x144xf32>
    %c2_68 = arith.constant 2 : index
    %c0_69 = arith.constant 0 : index
    %c0_70 = arith.constant 0 : index
    %117 = vector.load %arg2[%c2_68, %c0_69, %c0_70] : memref<3x144x128xf32, #tpu.memory_space<vmem>>, vector<1x144x128xf32>
    %118 = vector.shape_cast %117 : vector<1x144x128xf32> to vector<144x128xf32>
    %cst_71 = arith.constant dense<0.000000e+00> : vector<16x128xf32>
    %119 = tpu.matmul %116, %118, %cst_71 {dimension_numbers = #tpu.dot_dimension_numbers<[1], [0], [0], [1], [0, 0, 1, 1], [], []>} : vector<16x144xf32>, vector<144x128xf32>, vector<16x128xf32> -> vector<16x128xf32>
    %120 = arith.addf %115, %119 : vector<16x128xf32>
    %121 = tpu.concatenate %104, %120 in 0 : vector<16x128xf32>, vector<16x128xf32> -> vector<32x128xf32>
    %cst_72 = arith.constant dense<0.000000e+00> : vector<128xf32>
    %122 = vector.multi_reduction <add>, %121, %cst_72 [0] : vector<32x128xf32> to vector<128xf32>
    %123 = vector.shape_cast %122 : vector<128xf32> to vector<1x128xf32>
    %124 = arith.mulf %121, %121 : vector<32x128xf32>
    %cst_73 = arith.constant dense<0.000000e+00> : vector<128xf32>
    %125 = vector.multi_reduction <add>, %124, %cst_73 [0] : vector<32x128xf32> to vector<128xf32>
    %126 = vector.shape_cast %125 : vector<128xf32> to vector<1x128xf32>
    %c64_i32_74 = arith.constant 64 : i32
    %127 = tpu.dynamic_rotate %123 by %c64_i32_74 dim 1 : vector<1x128xf32>, i32 -> vector<1x128xf32>
    %128 = arith.addf %123, %127 : vector<1x128xf32>
    %c64_i32_75 = arith.constant 64 : i32
    %129 = tpu.dynamic_rotate %126 by %c64_i32_75 dim 1 : vector<1x128xf32>, i32 -> vector<1x128xf32>
    %130 = arith.addf %126, %129 : vector<1x128xf32>
    %c32_i32_76 = arith.constant 32 : i32
    %131 = tpu.dynamic_rotate %128 by %c32_i32_76 dim 1 : vector<1x128xf32>, i32 -> vector<1x128xf32>
    %132 = arith.addf %128, %131 : vector<1x128xf32>
    %c32_i32_77 = arith.constant 32 : i32
    %133 = tpu.dynamic_rotate %130 by %c32_i32_77 dim 1 : vector<1x128xf32>, i32 -> vector<1x128xf32>
    %134 = arith.addf %130, %133 : vector<1x128xf32>
    %c16_i32_78 = arith.constant 16 : i32
    %135 = tpu.dynamic_rotate %132 by %c16_i32_78 dim 1 : vector<1x128xf32>, i32 -> vector<1x128xf32>
    %136 = arith.addf %132, %135 : vector<1x128xf32>
    %c16_i32_79 = arith.constant 16 : i32
    %137 = tpu.dynamic_rotate %134 by %c16_i32_79 dim 1 : vector<1x128xf32>, i32 -> vector<1x128xf32>
    %138 = arith.addf %134, %137 : vector<1x128xf32>
    %c8_i32_80 = arith.constant 8 : i32
    %139 = tpu.dynamic_rotate %136 by %c8_i32_80 dim 1 : vector<1x128xf32>, i32 -> vector<1x128xf32>
    %140 = arith.addf %136, %139 : vector<1x128xf32>
    %c8_i32_81 = arith.constant 8 : i32
    %141 = tpu.dynamic_rotate %138 by %c8_i32_81 dim 1 : vector<1x128xf32>, i32 -> vector<1x128xf32>
    %142 = arith.addf %138, %141 : vector<1x128xf32>
    %cst_82 = arith.constant 0.001953125 : f32
    %143 = vector.broadcast %cst_82 : f32 to vector<1x128xf32>
    %144 = arith.mulf %140, %143 : vector<1x128xf32>
    %cst_83 = arith.constant 0.001953125 : f32
    %145 = vector.broadcast %cst_83 : f32 to vector<1x128xf32>
    %146 = arith.mulf %142, %145 : vector<1x128xf32>
    %147 = arith.mulf %144, %144 : vector<1x128xf32>
    %148 = arith.subf %146, %147 : vector<1x128xf32>
    %cst_84 = arith.constant 9.99999974E-6 : f32
    %149 = vector.broadcast %cst_84 : f32 to vector<1x128xf32>
    %150 = arith.addf %148, %149 : vector<1x128xf32>
    %151 = math.rsqrt %150 : vector<1x128xf32>
    %152 = arith.mulf %81, %151 : vector<1x128xf32>
    %153 = arith.mulf %144, %152 : vector<1x128xf32>
    %154 = arith.subf %82, %153 : vector<1x128xf32>
    %155 = vector.broadcast %152 : vector<1x128xf32> to vector<32x128xf32>
    %156 = arith.mulf %121, %155 : vector<32x128xf32>
    %157 = vector.broadcast %154 : vector<1x128xf32> to vector<32x128xf32>
    %158 = arith.addf %156, %157 : vector<32x128xf32>
    %cst_85 = arith.constant 0.000000e+00 : f32
    %159 = vector.broadcast %cst_85 : f32 to vector<32x128xf32>
    %160 = arith.maximumf %158, %159 : vector<32x128xf32>
    %c0_86 = arith.constant 0 : index
    %c0_87 = arith.constant 0 : index
    %161 = vector.load %arg7[%c0_86, %c0_87] : memref<32x128xf32, #tpu.memory_space<vmem>>, vector<32x128xf32>
    tpu.vector_store %arg7[%c0_86, %c0_87], %160 {strides = array<i32>} : memref<32x128xf32, #tpu.memory_space<vmem>>, vector<32x128xf32>,
    return
  }
}

</mosaic_0001>

<bundles_post_ra>
// kernel: tile.23
= control target key start
LH: loop header
LB: loop body
LE: loop exit
PB: predicated region body
PF: predicated region fallthrough
CT: control target
= control target key end

     0   :  { %s28_s0 = inlined_call_operand.vmem [shape: f32[8], index: 0, kind: input, shape index: {}]   ;;  %s29_s1 = inlined_call_operand.vmem [shape: f32[16,8], index: 1, kind: output, shape index: {}]  }
   0x1   :  { %v4_v0 = vld [vmem:[%s28_s0] ss:$0 sm:$0xff] }
   0x2   :  { %5 = vst [vmem:[%s29_s1] sm:$0xff] %v4_v0  ;;  %8 = vst [vmem:[%s29_s1 + $0x8] sm:$0xff] %v4_v0 }

// kernel: tile.24
= control target key start
LH: loop header
LB: loop body
LE: loop exit
PB: predicated region body
PF: predicated region fallthrough
CT: control target
= control target key end

     0   :  { %s133_s10 = smov 120   ;;  %s134_s11 = smov 104   ;;  %vm3_vm0 = vcmask 64512   ;;  %vm9_vm1 = vcmask 1048512   ;;  %vm15_vm2 = vcmask 982912   ;;  %vm21_vm3 = vcmask 917312   ;;  %s209_s0 = inlined_call_operand.vmem [shape: f32[16,8], index: 0, kind: input, shape index: {}]   ;;  %s210_s1 = inlined_call_operand.vmem [shape: f32[1,128], index: 1, kind: output, shape index: {}]  }
   0x1   :  { %v103_v0 = vld [vmem:[%s209_s0 + $0xf] sm:$0x1]   ;;  %v105_v1 = vld [vmem:[%s209_s0 + $0xd] sm:$0x1]   ;;  %v104_v2 = vld [vmem:[%s209_s0 + $0xe] sm:$0x1]  }
   0x2   :  { %7 = vrot.lane.b32.xlu0 %v103_v0, %s133_s10  ;;  %19 = vrot.lane.b32.xlu1 %v105_v1, %s134_s11  ;;  %v106_v3 = vld [vmem:[%s209_s0 + $0xc] sm:$0x1]   ;;  %s135_s16 = smov 112   ;;  %s136_s17 = smov 96   ;;  %v107_v4 = vld [vmem:[%s209_s0 + $0xb] sm:$0x1]  }
   0x3   :  { %v108_v5 = vld [vmem:[%s209_s0 + $0xa] sm:$0x1]   ;;  %v2_v6 = vld [vmem:[%s209_s0] sm:$0x1]   ;;  %s137_s24 = smov 88   ;;  %s138_s25 = smov 80  }
   0x4   :  { %4 = vst.msk [vmem:[#allocation0] sm:$0x1] %vm3_vm0, %v2_v6   ;;  %v109_v7 = vld [vmem:[%s209_s0 + $0x9] sm:$0x1]   ;;  %v110_v8 = vld [vmem:[%s209_s0 + $0x8] sm:$0x1]  }
   0x5   :  { %s139_s30 = smov 72   ;;  %s140_s2 = smov 64   ;;  %v111_v9 = vld [vmem:[%s209_s0 + $0x7] sm:$0x1]   ;;  %v112_v10 = vld [vmem:[%s209_s0 + $0x6] sm:$0x1]  }
   0x6   :  { %13 = vrot.lane.b32.xlu0 %v104_v2, %s135_s16  ;;  %25 = vrot.lane.b32.xlu1 %v106_v3, %s136_s17  ;;  %s141_s7 = smov 56   ;;  %s142_s8 = smov 48   ;;  %v113_v11 = vld [vmem:[%s209_s0 + $0x5] sm:$0x1]   ;;  %v114_v12 = vld [vmem:[%s209_s0 + $0x4] sm:$0x1]  }
   0x7   :  { %s143_s13 = smov 40   ;;  %s144_s14 = smov 32   ;;  %v115_v13 = vld [vmem:[%s209_s0 + $0x3] sm:$0x1]   ;;  %v116_v14 = vld [vmem:[%s209_s0 + $0x2] sm:$0x1]  }
   0x8   :  { %s145_s19 = smov 24   ;;  %s146_s20 = smov 16   ;;  %v117_v15 = vld [vmem:[%s209_s0 + $0x1] sm:$0x1]   ;;  %vm27_vm4 = vcmask 851712   ;;  %vm33_vm5 = vcmask 786112  }
   0x9   :  { %s147_s0 = smov 8   ;;  %vm39_vm6 = vcmask 720512   ;;  %vm45_vm7 = vcmask 654912   ;;  %vm51_vm8 = vcmask 589312   ;;  %vm57_vm9 = vcmask 523712  }
   0xa   :  { %31 = vrot.lane.b32.xlu0 %v107_v4, %s137_s24  ;;  %37 = vrot.lane.b32.xlu1 %v108_v5, %s138_s25  ;;  %vm63_vm10 = vcmask 458112   ;;  %vm69_vm11 = vcmask 392512   ;;  %vm75_vm12 = vcmask 326912   ;;  %vm81_vm13 = vcmask 261312  }
   0xb   :  { %vm87_vm14 = vcmask 195712   ;;  %vm93_vm15 = vcmask 130112  }
   0xe   :  { %43 = vrot.lane.b32.xlu0 %v109_v7, %s139_s30  ;;  %49 = vrot.lane.b32.xlu1 %v110_v8, %s140_s2 }
  0x12   :  { %55 = vrot.lane.b32.xlu0 %v111_v9, %s141_s7  ;;  %61 = vrot.lane.b32.xlu1 %v112_v10, %s142_s8 }
  0x16   :  { %67 = vrot.lane.b32.xlu0 %v113_v11, %s143_s13  ;;  %73 = vrot.lane.b32.xlu1 %v114_v12, %s144_s14 }
  0x1a   :  { %79 = vrot.lane.b32.xlu0 %v115_v13, %s145_s19  ;;  %85 = vrot.lane.b32.xlu1 %v116_v14, %s146_s20 }
  0x1e   :  { %91 = vrot.lane.b32.xlu0 %v117_v15, %s147_s0 }
  0x74   :  { %v8_v16 = vpop.permute.xlu0 %7   ;;  %v20_v17 = vpop.permute.xlu1 %19  }
  0x75   :  { %10 = vst.msk [vmem:[#allocation0] sm:$0x1] %vm9_vm1, %v8_v16  }
  0x78   :  { %v14_v18 = vpop.permute.xlu0 %13   ;;  %v26_v19 = vpop.permute.xlu1 %25  }
  0x79   :  { %16 = vst.msk [vmem:[#allocation0] sm:$0x1] %vm15_vm2, %v14_v18  }
  0x7a   :  { %22 = vst.msk [vmem:[#allocation0] sm:$0x1] %vm21_vm3, %v20_v17  }
  0x7b   :  { %28 = vst.msk [vmem:[#allocation0] sm:$0x1] %vm27_vm4, %v26_v19  }
  0x7c   :  { %v32_v20 = vpop.permute.xlu0 %31   ;;  %v38_v21 = vpop.permute.xlu1 %37  }
  0x7d   :  { %34 = vst.msk [vmem:[#allocation0] sm:$0x1] %vm33_vm5, %v32_v20  }
  0x7e   :  { %40 = vst.msk [vmem:[#allocation0] sm:$0x1] %vm39_vm6, %v38_v21  }
  0x80   :  { %v44_v22 = vpop.permute.xlu0 %43   ;;  %v50_v23 = vpop.permute.xlu1 %49  }
  0x81   :  { %46 = vst.msk [vmem:[#allocation0] sm:$0x1] %vm45_vm7, %v44_v22  }
  0x82   :  { %52 = vst.msk [vmem:[#allocation0] sm:$0x1] %vm51_vm8, %v50_v23  }
  0x84   :  { %v56_v24 = vpop.permute.xlu0 %55   ;;  %v62_v25 = vpop.permute.xlu1 %61  }
  0x85   :  { %58 = vst.msk [vmem:[#allocation0] sm:$0x1] %vm57_vm9, %v56_v24  }
  0x86   :  { %64 = vst.msk [vmem:[#allocation0] sm:$0x1] %vm63_vm10, %v62_v25  }
  0x88   :  { %v68_v26 = vpop.permute.xlu0 %67   ;;  %v74_v27 = vpop.permute.xlu1 %73  }
  0x89   :  { %70 = vst.msk [vmem:[#allocation0] sm:$0x1] %vm69_vm11, %v68_v26  }
  0x8a   :  { %76 = vst.msk [vmem:[#allocation0] sm:$0x1] %vm75_vm12, %v74_v27  }
  0x8c   :  { %v80_v28 = vpop.permute.xlu0 %79   ;;  %v86_v29 = vpop.permute.xlu1 %85  }
  0x8d   :  { %82 = vst.msk [vmem:[#allocation0] sm:$0x1] %vm81_vm13, %v80_v28  }
  0x8e   :  { %88 = vst.msk [vmem:[#allocation0] sm:$0x1] %vm87_vm14, %v86_v29  }
  0x90   :  { %v92_v30 = vpop.permute.xlu0 %91  }
  0x91   :  { %94 = vst.msk [vmem:[#allocation0] sm:$0x1] %vm93_vm15, %v92_v30  }
  0x98   :  { %v99_v31 = vld [vmem:[#allocation0] sm:$0x1] }
  0x99   :  { %102 = vst [vmem:[%s210_s1] sm:$0x1] %v99_v31 }

// kernel: bridge_forward.1
= control target key start
LH: loop header
LB: loop body
LE: loop exit
PB: predicated region body
PF: predicated region fallthrough
CT: control target
= control target key end

     0   :  { %s1732_s28 = smov 4   ;;  %vm48_vm0 = vcmask 31744   ;;  %vm53_vm1 = vcmask 556032   ;;  %vm60_vm2 = vcmask 1040384   ;;  %vm76_vm3 = vcmask 1041408   ;;  %s1734_s16 = smov 32   ;;  %s2772_s0 = inlined_call_operand.vmem [shape: f32[32,64], index: 0, kind: input, shape index: {}]   ;;  %s2773_s1 = inlined_call_operand.vmem [shape: f32[3,72,128], index: 1, kind: input, shape index: {}]   ;;  %s2774_s2 = inlined_call_operand.vmem [shape: f32[3,144,128], index: 2, kind: input, shape index: {}]   ;;  %s2775_s3 = inlined_call_operand.vmem [shape: f32[1,128], index: 3, kind: input, shape index: {}]   ;;  %s2776_s4 = inlined_call_operand.vmem [shape: f32[1,128], index: 4, kind: input, shape index: {}]   ;;  %s2777_s5 = inlined_call_operand.vmem [shape: f32[1,128], index: 5, kind: input, shape index: {}]   ;;  %s2778_s6 = inlined_call_operand.vmem [shape: f32[1,128], index: 6, kind: input, shape index: {}]   ;;  %s2779_s7 = inlined_call_operand.vmem [shape: f32[32,128], index: 7, kind: output, shape index: {}]  }
   0x1   :  { %v28_v0 = vld [vmem:[%s2772_s0 + $0x10] sm:$0xff]  ;;  %v27_v1 = vld [vmem:[%s2772_s0 + $0x8] sm:$0xff]  ;;  %v29_v2 = vld [vmem:[%s2772_s0 + $0x18] sm:$0xff]  ;;  %vm68_vm4 = vcmask 1042432   ;;  %vm107_vm5 = vcmask 588800   ;;  %vm101_vm6 = vcmask 1046528  }
   0x2   :  { %40 = vrot.lane.b32.xlu1 %v28_v0, %s1732_s28  ;;  %38 = vrot.lane.b32.xlu0 %v27_v1, %s1732_s28  ;;  %v1790_v3 = vld [vmem:[%s2773_s1 + $0x40] sm:$0xff]  ;;  %v1799_v5 = vld [vmem:[%s2773_s1 + $0x38] sm:$0xff]  ;;  %vm364_vm7 = vcmask 1044480   ;;  %vm276_vm8 = vcmask 1045504   ;;  %vm532_vm9 = vcmask 1043456   ;;  %s1735_s17 = smov 16   ;;  %vm1501_vm12 = vmneg %vm60_vm2 }
   0x3   :  { %v26_v4 = vld [vmem:[%s2772_s0] sm:$0xff]  ;;  %1617 = vmatprep.subr.mxu1 %v1790_v3  ;;  %v1804_v6 = vld [vmem:[%s2773_s1 + $0x88] sm:$0xff]  ;;  %v1818_v8 = vld [vmem:[%s2773_s1 + $0x30] sm:$0xff]  ;;  %s1736_s0 = smov 8   ;;  %vm716_vm10 = vcmask 64512   ;;  %vm817_vm11 = vcmask 130048  }
   0x4   :  { %1618 = vmatpush3.msra.mxu1 %v1790_v3  ;;  %1596 = vmatprep.subr.mxu0 %v1804_v6  ;;  %v1811_v7 = vld [vmem:[%s2773_s1 + $0x80] sm:$0xff]  ;;  %v1823_v9 = vld [vmem:[%s2773_s1 + $0x78] sm:$0xff]  ;;  %v1830_v10 = vld [vmem:[%s2773_s1 + $0x28] sm:$0xff] }
   0x5   :  { %1619 = vmatprep.subr.mxu1 %v1799_v5  ;;  %1597 = vmatpush3.msra.mxu0 %v1804_v6  ;;  %v1837_v11 = vld [vmem:[%s2773_s1 + $0x70] sm:$0xff]  ;;  %v1844_v12 = vld [vmem:[%s2773_s1 + $0x20] sm:$0xff]  ;;  %v1851_v13 = vld [vmem:[%s2773_s1 + $0x68] sm:$0xff] }
   0x6   :  { %42 = vrot.lane.b32.xlu1 %v29_v2, %s1732_s28  ;;  %36 = vrot.lane.b32.xlu0 %v26_v4, %s1732_s28  ;;  %v1858_v14 = vld [vmem:[%s2773_s1 + $0x18] sm:$0xff]  ;;  %v1865_v15 = vld [vmem:[%s2773_s1 + $0x60] sm:$0xff] }
   0x7   :  { %1620 = vmatpush3.msra.mxu1 %v1799_v5  ;;  %1598 = vmatprep.subr.mxu0 %v1811_v7  ;;  %v1872_v16 = vld [vmem:[%s2773_s1 + $0x10] sm:$0xff]  ;;  %v1879_v17 = vld [vmem:[%s2773_s1 + $0x58] sm:$0xff]  ;;  %v1886_v18 = vld [vmem:[%s2773_s1 + $0x8] sm:$0xff] }
   0x8   :  { %1621 = vmatprep.subr.mxu1 %v1818_v8  ;;  %1599 = vmatpush3.msra.mxu0 %v1811_v7  ;;  %v1893_v19 = vld [vmem:[%s2773_s1 + $0x50] sm:$0xff]  ;;  %v1900_v20 = vld [vmem:[%s2773_s1] sm:$0xff]  ;;  %v1907_v21 = vld [vmem:[%s2773_s1 + $0x48] sm:$0xff] }
   0x9   :  { %1622 = vmatpush3.msra.mxu1 %v1818_v8  ;;  %1600 = vmatprep.subr.mxu0 %v1823_v9  ;;  %v1916_v22 = vld [vmem:[%s2773_s1 + $0xd0] sm:$0xff]  ;;  %v1470_v55 = vld [vmem:[%s2773_s1 + $0xc8] sm:$0xff]  ;;  %v1469_v57 = vld [vmem:[%s2773_s1 + $0xc0] sm:$0xff] }
   0xa   :  { %1623 = vmatprep.subr.mxu1 %v1830_v10  ;;  %1601 = vmatpush3.msra.mxu0 %v1823_v9  ;;  %v1468_v58 = vld [vmem:[%s2773_s1 + $0xb8] sm:$0xff]  ;;  %v1467_v59 = vld [vmem:[%s2773_s1 + $0xb0] sm:$0xff]  ;;  %v1466_v60 = vld [vmem:[%s2773_s1 + $0xa8] sm:$0xff] }
   0xb   :  { %1624 = vmatpush3.msra.mxu1 %v1830_v10  ;;  %1602 = vmatprep.subr.mxu0 %v1837_v11  ;;  %v1465_v62 = vld [vmem:[%s2773_s1 + $0xa0] sm:$0xff]  ;;  %v1464_v0 = vld [vmem:[%s2773_s1 + $0x98] sm:$0xff]  ;;  %v1463_v2 = vld [vmem:[%s2773_s1 + $0x90] sm:$0xff]  ;;  %s1733_s1 = smov 64  }
   0xc   :  { %1625 = vmatprep.subr.mxu1 %v1844_v12  ;;  %1603 = vmatpush3.msra.mxu0 %v1837_v11 }
   0xd   :  { %1626 = vmatpush3.msra.mxu1 %v1844_v12  ;;  %1604 = vmatprep.subr.mxu0 %v1851_v13 }
   0xe   :  { %1627 = vmatprep.subr.mxu1 %v1858_v14  ;;  %1605 = vmatpush3.msra.mxu0 %v1851_v13 }
   0xf   :  { %1628 = vmatpush3.msra.mxu1 %v1858_v14  ;;  %1606 = vmatprep.subr.mxu0 %v1865_v15 }
  0x10   :  { %1629 = vmatprep.subr.mxu1 %v1872_v16  ;;  %1607 = vmatpush3.msra.mxu0 %v1865_v15 }
  0x11   :  { %1630 = vmatpush3.msra.mxu1 %v1872_v16  ;;  %1608 = vmatprep.subr.mxu0 %v1879_v17 }
  0x12   :  { %1631 = vmatprep.subr.mxu1 %v1886_v18  ;;  %1609 = vmatpush3.msra.mxu0 %v1879_v17 }
  0x13   :  { %1632 = vmatpush3.msra.mxu1 %v1886_v18  ;;  %1610 = vmatprep.subr.mxu0 %v1893_v19 }
  0x14   :  { %1633 = vmatprep.subr.mxu1 %v1900_v20  ;;  %1611 = vmatpush3.msra.mxu0 %v1893_v19 }
  0x15   :  { %1634 = vmatpush3.msra.mxu1 %v1900_v20  ;;  %1612 = vmatprep.subr.mxu0 %v1907_v21 }
  0x16   :  { %1659 = vmatprep.subr.mxu1 %v1804_v6  ;;  %1613 = vmatpush3.msra.mxu0 %v1907_v21 }
  0x17   :  { %1638 = vmatprep.subr.mxu0 %v1916_v22 }
  0x74   :  { %v41_v23 = vpop.permute.xlu1 %40  ;;  %v39_v24 = vpop.permute.xlu0 %38 }
  0x75   :  { %v51_v25 = vsel %vm48_vm0, 0.0, %v41_v23  ;;  %v50_v26 = vsel %vm48_vm0, 0.0, %v39_v24 }
  0x76   :  { %v56_v27 = vsel %vm53_vm1, %v51_v25, 0.0  ;;  %v55_v28 = vsel %vm53_vm1, %v50_v26, 0.0 }
  0x77   :  { %v62_v29 = vrot.slane %v55_v28, 7  ;;  %v69_v30 = vrot.slane %v56_v27, 5 }
  0x78   :  { %v43_v31 = vpop.permute.xlu1 %42  ;;  %v37_v32 = vpop.permute.xlu0 %36 }
  0x79   :  { %v75_v33 = vsel %vm60_vm2, %v62_v29, 0.0  ;;  %v52_v34 = vsel %vm48_vm0, 0.0, %v43_v31  ;;  %v49_v35 = vsel %vm48_vm0, 0.0, %v37_v32 }
  0x7a   :  { %v77_v36 = vsel %vm76_vm3, %v75_v33, 0.0  ;;  %v57_v37 = vsel %vm53_vm1, %v52_v34, 0.0  ;;  %v54_v38 = vsel %vm53_vm1, %v49_v35, 0.0 }
  0x7b   :  { %v70_v39 = vrot.slane %v57_v37, 5  ;;  %v61_v40 = vrot.slane %v54_v38, 7  ;;  %v1934_v41 = vsel %vm68_vm4, %v77_v36, %v69_v30 }
  0x7c   :  { %v365_v47 = vrot.slane %v1934_v41, 3  ;;  %v105_v49 = vrot.slane %v1934_v41, 1 }
  0x7d   :  { %v1937_v42 = vsel %vm68_vm4, %v69_v30, %v70_v39  ;;  %v74_v43 = vsel %vm60_vm2, 0.0, %v61_v40  ;;  %v1941_v44 = vsel %vm60_vm2, %v61_v40, %v62_v29  ;;  %v1987_v61 = vsel %vm68_vm4, %v70_v39, 0.0 }
  0x7e   :  { %v102_v45 = vrot.slane %v74_v43, 1  ;;  %1635 = vmatprep.mubr.msk.f32.mxu1 %vm107_vm5, %v74_v43  ;;  %v103_v46 = vrot.slane %v1941_v44, 1  ;;  %v366_v48 = vrot.slane %v1937_v42, 3  ;;  %v277_v50 = vrot.slane %v74_v43, 2 }
  0x7f   :  { %1636 = vmatmul.mubr.msk.f32.vlgmr.msra.gmra.mxu1 %vm107_vm5, %v1941_v44  ;;  %v278_v51 = vrot.slane %v1941_v44, 2  ;;  %v368_v63 = vrot.slane %v1987_v61, 3  ;;  %v534_v1 = vrot.slane %v1937_v42, 4 }
  0x80   :  { %1660 = vmatpush3.msra.mxu1 %v1804_v6  ;;  %v104_v52 = vsel %vm101_vm6, %v102_v45, %v103_v46  ;;  %v367_v53 = vsel %vm364_vm7, %v365_v47, %v366_v48  ;;  %v106_v54 = vsel %vm101_vm6, %v103_v46, %v105_v49  ;;  %v533_v6 = vrot.slane %v1934_v41, 4 }
  0x81   :  { %1661 = vmatprep.subr.mxu1 %v1811_v7  ;;  %1614 = vmatprep.mubr.msk.f32.mxu0 %vm107_vm5, %v104_v52  ;;  %v279_v56 = vsel %vm276_vm8, %v277_v50, %v278_v51  ;;  %v369_v4 = vsel %vm364_vm7, %v366_v48, %v368_v63 }
  0x82   :  { %1662 = vmatpush3.msra.mxu1 %v1811_v7  ;;  %1677 = vmatprep.mubr.msk.f32.mxu1 %vm107_vm5, %v367_v53  ;;  %v280_v7 = vrot.slane %v1934_v41, 2 }
  0x83   :  { %1615 = vmatmul.mubr.msk.f32.vlgmr.msra.gmra.mxu0 %vm107_vm5, %v106_v54  ;;  %1663 = vmatprep.subr.mxu1 %v1823_v9 }
  0x84   :  { %1639 = vmatpush3.msra.mxu0 %v1916_v22  ;;  %1656 = vmatprep.mubr.msk.f32.mxu0 %vm107_vm5, %v279_v56 }
  0x85   :  { %1640 = vmatprep.subr.mxu0 %v1470_v55  ;;  %1664 = vmatpush3.msra.mxu1 %v1823_v9  ;;  %v449_v9 = vrot.slane %v1937_v42, 2 }
  0x86   :  { %1641 = vmatpush3.msra.mxu0 %v1470_v55  ;;  %1665 = vmatprep.subr.mxu1 %v1837_v11 }
  0x87   :  { %1642 = vmatprep.subr.mxu0 %v1469_v57  ;;  %1666 = vmatpush3.msra.mxu1 %v1837_v11  ;;  %v535_v11 = vsel %vm532_vm9, %v533_v6, %v534_v1  ;;  %v1737_v6 = vmov 0.0  }
  0x88   :  { %1643 = vmatpush3.msra.mxu0 %v1469_v57  ;;  %1667 = vmatprep.subr.mxu1 %v1851_v13 }
  0x89   :  { %1644 = vmatprep.subr.mxu0 %v1468_v58  ;;  %1668 = vmatpush3.msra.mxu1 %v1851_v13  ;;  %v281_v13 = vsel %vm276_vm8, %v278_v51, %v280_v7 }
  0x8a   :  { %1645 = vmatpush3.msra.mxu0 %v1468_v58  ;;  %1669 = vmatprep.subr.mxu1 %v1865_v15 }
  0x8b   :  { %1646 = vmatprep.subr.mxu0 %v1467_v59  ;;  %1670 = vmatpush3.msra.mxu1 %v1865_v15  ;;  %v450_v15 = vsel %vm276_vm8, %v280_v7, %v449_v9  ;;  %v2085_v7 = vld [vmem:[%s2774_s2 + $0x78] sm:$0xff] }
  0x8c   :  { %1647 = vmatpush3.msra.mxu0 %v1467_v59  ;;  %1671 = vmatprep.subr.mxu1 %v1879_v17 }
  0x8d   :  { %1648 = vmatprep.subr.mxu0 %v1466_v60  ;;  %1672 = vmatpush3.msra.mxu1 %v1879_v17 }
  0x8e   :  { %1649 = vmatpush3.msra.mxu0 %v1466_v60  ;;  %1673 = vmatprep.subr.mxu1 %v1893_v19 }
  0x8f   :  { %1650 = vmatprep.subr.mxu0 %v1465_v62  ;;  %1674 = vmatpush3.msra.mxu1 %v1893_v19 }
  0x90   :  { %1651 = vmatpush3.msra.mxu0 %v1465_v62  ;;  %1675 = vmatprep.subr.mxu1 %v1907_v21 }
  0x91   :  { %1652 = vmatprep.subr.mxu0 %v1464_v0  ;;  %1676 = vmatpush3.msra.mxu1 %v1907_v21 }
  0x92   :  { %1653 = vmatpush3.msra.mxu0 %v1464_v0  ;;  %1678 = vmatmul.mubr.msk.f32.vlgmr.msra.gmra.mxu1 %vm107_vm5, %v369_v4 }
  0x93   :  { %1701 = vmatprep.subr.mxu1 %v1916_v22  ;;  %1654 = vmatprep.subr.mxu0 %v1463_v2 }
  0x94   :  { %1702 = vmatpush3.msra.mxu1 %v1916_v22  ;;  %1719 = vmatprep.mubr.msk.f32.mxu1 %vm107_vm5, %v535_v11  ;;  %v2096_v11 = vld [vmem:[%s2774_s2 + $0x108] sm:$0xff] }
  0x95   :  { %1655 = vmatpush3.msra.mxu0 %v1463_v2  ;;  %1703 = vmatprep.subr.mxu1 %v1470_v55 }
  0x96   :  { %1657 = vmatmul.mubr.msk.f32.vlgmr.msra.gmra.mxu0 %vm107_vm5, %v281_v13  ;;  %1680 = vmatprep.subr.mxu0 %v1790_v3  ;;  %v2103_v13 = vld [vmem:[%s2774_s2 + $0x100] sm:$0xff] }
  0x97   :  { %1704 = vmatpush3.msra.mxu1 %v1470_v55  ;;  %1681 = vmatpush3.msra.mxu0 %v1790_v3  ;;  %v536_v3 = vrot.slane %v1987_v61, 4 }
  0x98   :  { %1698 = vmatprep.mubr.msk.f32.mxu0 %vm107_vm5, %v450_v15  ;;  %1705 = vmatprep.subr.mxu1 %v1469_v57  ;;  %v2110_v15 = vld [vmem:[%s2774_s2 + $0x68] sm:$0xff] }
  0x99   :  { %1682 = vmatprep.subr.mxu0 %v1799_v5  ;;  %1706 = vmatpush3.msra.mxu1 %v1469_v57 }
  0x9a   :  { %1683 = vmatpush3.msra.mxu0 %v1799_v5  ;;  %1707 = vmatprep.subr.mxu1 %v1468_v58  ;;  %v451_v5 = vrot.slane %v1987_v61, 2 }
  0x9b   :  { %1684 = vmatprep.subr.mxu0 %v1818_v8  ;;  %1708 = vmatpush3.msra.mxu1 %v1468_v58 }
  0x9c   :  { %1685 = vmatpush3.msra.mxu0 %v1818_v8  ;;  %1709 = vmatprep.subr.mxu1 %v1467_v59  ;;  %v537_v8 = vsel %vm532_vm9, %v534_v1, %v536_v3  ;;  %v2115_v3 = vld [vmem:[%s2774_s2 + $0xf8] sm:$0xff] }
  0x9d   :  { %1686 = vmatprep.subr.mxu0 %v1830_v10  ;;  %1710 = vmatpush3.msra.mxu1 %v1467_v59 }
  0x9e   :  { %1687 = vmatpush3.msra.mxu0 %v1830_v10  ;;  %1711 = vmatprep.subr.mxu1 %v1466_v60  ;;  %v452_v10 = vsel %vm276_vm8, %v449_v9, %v451_v5  ;;  %v2091_v9 = vld [vmem:[%s2774_s2 + $0x70] sm:$0xff]  ;;  %v2124_v5 = vld [vmem:[%s2774_s2 + $0x60] sm:$0xff] }
  0x9f   :  { %1688 = vmatprep.subr.mxu0 %v1844_v12  ;;  %1712 = vmatpush3.msra.mxu1 %v1466_v60 }
  0xa0   :  { %1689 = vmatpush3.msra.mxu0 %v1844_v12  ;;  %1713 = vmatprep.subr.mxu1 %v1465_v62 }
  0xa1   :  { %1690 = vmatprep.subr.mxu0 %v1858_v14  ;;  %1714 = vmatpush3.msra.mxu1 %v1465_v62 }
  0xa2   :  { %1691 = vmatpush3.msra.mxu0 %v1858_v14  ;;  %1715 = vmatprep.subr.mxu1 %v1464_v0 }
  0xa3   :  { %1692 = vmatprep.subr.mxu0 %v1872_v16  ;;  %1716 = vmatpush3.msra.mxu1 %v1464_v0 }
  0xa4   :  { %1693 = vmatpush3.msra.mxu0 %v1872_v16  ;;  %1717 = vmatprep.subr.mxu1 %v1463_v2 }
  0xa5   :  { %1694 = vmatprep.subr.mxu0 %v1886_v18  ;;  %1718 = vmatpush3.msra.mxu1 %v1463_v2 }
  0xa6   :  { %1695 = vmatpush3.msra.mxu0 %v1886_v18  ;;  %1720 = vmatmul.mubr.msk.f32.vlgmr.msra.gmra.mxu1 %vm107_vm5, %v537_v8  ;;  %v2129_v8 = vld [vmem:[%s2774_s2 + $0xf0] sm:$0xff] }
  0xa7   :  { %1696 = vmatprep.subr.mxu0 %v1900_v20  ;;  %901 = vmatprep.subr.mxu1 %v1737_v6 }
  0xa8   :  { %1697 = vmatpush3.msra.mxu0 %v1900_v20  ;;  %902 = vmatpush1.msra.mxu1 %v2085_v7 }
  0xa9   :  { %1699 = vmatmul.mubr.msk.f32.vlgmr.msra.gmra.mxu0 %vm107_vm5, %v452_v10  ;;  %822 = vmatprep.subr.mxu0 %v1737_v6  ;;  %v2138_v10 = vld [vmem:[%s2774_s2 + $0x58] sm:$0xff] }
  0xaa   :  { %823 = vmatpush1.msra.mxu0 %v2096_v11  ;;  %903 = vmatprep.subr.mxu1 %v1737_v6 }
  0xab   :  { %824 = vmatprep.subr.mxu0 %v1737_v6  ;;  %904 = vmatpush1.msra.mxu1 %v2091_v9 }
  0xac   :  { %825 = vmatpush1.msra.mxu0 %v2103_v13  ;;  %905 = vmatprep.subr.mxu1 %v1737_v6 }
  0xad   :  { %826 = vmatprep.subr.mxu0 %v1737_v6  ;;  %906 = vmatpush1.msra.mxu1 %v2110_v15 }
  0xae   :  { %827 = vmatpush1.msra.mxu0 %v2115_v3  ;;  %907 = vmatprep.subr.mxu1 %v1737_v6 }
  0xaf   :  { %828 = vmatprep.subr.mxu0 %v1737_v6  ;;  %908 = vmatpush1.msra.mxu1 %v2124_v5 }
  0xb0   :  { %829 = vmatpush1.msra.mxu0 %v2129_v8  ;;  %909 = vmatprep.subr.mxu1 %v1737_v6 }
  0xb1   :  { %830 = vmatprep.subr.mxu0 %v1737_v6  ;;  %910 = vmatpush1.msra.mxu1 %v2138_v10 }
  0xb2   :  { %911 = vmatprep.subr.mxu1 %v1737_v6 }
 0x13f   :  { %v1637_v14 = vpop.f32.mrf.mxu1 }
 0x141   :  { %v257_v17 = vpop.f32.mrf.mxu1 }
 0x143   :  { %v1616_v12 = vpop.f32.mrf.mxu0 }
 0x144   :  { %v263_v24 = vadd.f32 %v1637_v14, %v1616_v12  ;;  %v2143_v12 = vld [vmem:[%s2774_s2 + $0xe8] sm:$0xff]  ;;  %v2152_v14 = vld [vmem:[%s2774_s2 + $0x50] sm:$0xff] }
 0x145   :  { %v178_v16 = vpop.f32.mrf.mxu0  ;;  %831 = vmatpush1.msra.mxu0 %v2143_v12  ;;  %912 = vmatpush1.msra.mxu1 %v2152_v14 }
 0x146   :  { %v258_v18 = vadd.f32 %v257_v17, %v178_v16  ;;  %v2157_v16 = vld [vmem:[%s2774_s2 + $0xe0] sm:$0xff]  ;;  %832 = vmatprep.subr.mxu0 %v1737_v6  ;;  %v2166_v17 = vld [vmem:[%s2774_s2 + $0x48] sm:$0xff]  ;;  %913 = vmatprep.subr.mxu1 %v1737_v6 }
 0x147   :  { %833 = vmatpush1.msra.mxu0 %v2157_v16  ;;  %914 = vmatpush1.msra.mxu1 %v2166_v17 }
 0x148   :  { %834 = vmatprep.subr.mxu0 %v1737_v6  ;;  %915 = vmatprep.subr.mxu1 %v1737_v6 }
 0x152   :  { %v1679_v21 = vpop.f32.mrf.mxu1 }
 0x154   :  { %v440_v23 = vpop.f32.mrf.mxu1 }
 0x156   :  { %v1658_v19 = vpop.f32.mrf.mxu0 }
 0x157   :  { %v2049_v28 = vadd.f32 %v1658_v19, %v263_v24  ;;  %v2171_v19 = vld [vmem:[%s2774_s2 + $0xd8] sm:$0xff]  ;;  %v2208_v24 = vld [vmem:[%s2774_s2 + $0x30] sm:$0xff] }
 0x158   :  { %v352_v22 = vpop.f32.mrf.mxu0  ;;  %835 = vmatpush1.msra.mxu0 %v2171_v19 }
 0x159   :  { %v2047_v25 = vadd.f32 %v352_v22, %v258_v18  ;;  %v629_v33 = vmul.f32 %v2049_v28, %v2049_v28  ;;  %v2185_v22 = vld [vmem:[%s2774_s2 + $0xd0] sm:$0xff]  ;;  %836 = vmatprep.subr.mxu0 %v1737_v6  ;;  %v2194_v18 = vld [vmem:[%s2774_s2 + $0x38] sm:$0xff] }
 0x15a   :  { %837 = vmatpush1.msra.mxu0 %v2185_v22 }
 0x15b   :  { %v628_v30 = vmul.f32 %v2047_v25, %v2047_v25  ;;  %v619_v34 = vadd.f32 %v2049_v28, %v2047_v25  ;;  %838 = vmatprep.subr.mxu0 %v1737_v6 }
 0x15d   :  { %v632_v37 = vadd.f32 %v629_v33, %v628_v30  ;;  %v2241_v30 = vld [vmem:[%s2774_s2 + $0xb0] sm:$0xff] }
 0x15e   :  { %v2264_v33 = vld [vmem:[%s2774_s2 + $0x10] sm:$0xff] }
 0x166   :  { %v1721_v26 = vpop.f32.mrf.mxu1 }
 0x168   :  { %v608_v32 = vpop.f32.mrf.mxu1 }
 0x169   :  { %v1700_v27 = vpop.f32.mrf.mxu0 }
 0x16a   :  { %v529_v20 = vadd.f32 %v1700_v27, %v1679_v21  ;;  %v2180_v21 = vld [vmem:[%s2774_s2 + $0x40] sm:$0xff]  ;;  %v2222_v27 = vld [vmem:[%s2774_s2 + $0x28] sm:$0xff] }
 0x16b   :  { %v523_v29 = vpop.f32.mrf.mxu0  ;;  %916 = vmatpush1.msra.mxu1 %v2180_v21 }
 0x16c   :  { %v524_v31 = vadd.f32 %v523_v29, %v440_v23  ;;  %v2057_v35 = vadd.f32 %v1721_v26, %v529_v20  ;;  %v2199_v23 = vld [vmem:[%s2774_s2 + $0xc8] sm:$0xff]  ;;  %917 = vmatprep.subr.mxu1 %v1737_v6  ;;  %v2213_v26 = vld [vmem:[%s2774_s2 + $0xc0] sm:$0xff]  ;;  %v2227_v20 = vld [vmem:[%s2774_s2 + $0xb8] sm:$0xff] }
 0x16d   :  { %918 = vmatpush1.msra.mxu1 %v2194_v18  ;;  %839 = vmatpush1.msra.mxu0 %v2199_v23  ;;  %v2236_v29 = vld [vmem:[%s2774_s2 + $0x20] sm:$0xff] }
 0x16e   :  { %v2059_v36 = vadd.f32 %v608_v32, %v524_v31  ;;  %v631_v40 = vmul.f32 %v2057_v35, %v2057_v35  ;;  %919 = vmatprep.subr.mxu1 %v1737_v6  ;;  %840 = vmatprep.subr.mxu0 %v1737_v6  ;;  %v2250_v31 = vld [vmem:[%s2774_s2 + $0x18] sm:$0xff]  ;;  %v2255_v32 = vld [vmem:[%s2774_s2 + $0xa8] sm:$0xff] }
 0x16f   :  { %920 = vmatpush1.msra.mxu1 %v2208_v24  ;;  %841 = vmatpush1.msra.mxu0 %v2213_v26 }
 0x170   :  { %v620_v38 = vadd.f32 %v619_v34, %v2059_v36  ;;  %v630_v39 = vmul.f32 %v2059_v36, %v2059_v36  ;;  %921 = vmatprep.subr.mxu1 %v1737_v6  ;;  %842 = vmatprep.subr.mxu0 %v1737_v6  ;;  %v2269_v34 = vld [vmem:[%s2774_s2 + $0xa0] sm:$0xff] }
 0x171   :  { %922 = vmatpush1.msra.mxu1 %v2222_v27  ;;  %843 = vmatpush1.msra.mxu0 %v2227_v20 }
 0x172   :  { %v621_v41 = vadd.f32 %v620_v38, %v2057_v35  ;;  %v633_v42 = vadd.f32 %v632_v37, %v630_v39  ;;  %923 = vmatprep.subr.mxu1 %v1737_v6  ;;  %844 = vmatprep.subr.mxu0 %v1737_v6  ;;  %v2278_v37 = vld [vmem:[%s2774_s2 + $0x8] sm:$0xff]  ;;  %v2287_v38 = vld [vmem:[%s2774_s2] sm:$0xff] }
 0x173   :  { %924 = vmatpush1.msra.mxu1 %v2236_v29  ;;  %845 = vmatpush1.msra.mxu0 %v2241_v30 }
 0x174   :  { %v622_v43 = vrot.slane %v621_v41, 4  ;;  %v634_v44 = vadd.f32 %v633_v42, %v631_v40  ;;  %925 = vmatprep.subr.mxu1 %v1737_v6  ;;  %846 = vmatprep.subr.mxu0 %v1737_v6 }
 0x175   :  { %926 = vmatpush1.msra.mxu1 %v2250_v31  ;;  %847 = vmatpush1.msra.mxu0 %v2255_v32 }
 0x176   :  { %v623_v45 = vadd.f32 %v622_v43, %v621_v41  ;;  %v635_v46 = vrot.slane %v634_v44, 4  ;;  %927 = vmatprep.subr.mxu1 %v1737_v6  ;;  %848 = vmatprep.subr.mxu0 %v1737_v6 }
 0x177   :  { %928 = vmatpush1.msra.mxu1 %v2264_v33  ;;  %849 = vmatpush1.msra.mxu0 %v2269_v34 }
 0x178   :  { %v624_v47 = vrot.slane %v623_v45, 2  ;;  %v636_v48 = vadd.f32 %v635_v46, %v634_v44  ;;  %929 = vmatprep.subr.mxu1 %v1737_v6  ;;  %850 = vmatprep.subr.mxu0 %v1737_v6 }
 0x179   :  { %930 = vmatpush1.msra.mxu1 %v2278_v37 }
 0x17a   :  { %v625_v49 = vadd.f32 %v624_v47, %v623_v45  ;;  %v637_v50 = vrot.slane %v636_v48, 2  ;;  %931 = vmatprep.subr.mxu1 %v1737_v6 }
 0x17b   :  { %932 = vmatpush1.msra.mxu1 %v2287_v38 }
 0x17c   :  { %v626_v51 = vrot.slane %v625_v49, 1  ;;  %v638_v52 = vadd.f32 %v637_v50, %v636_v48  ;;  %961 = vmatprep.subr.mxu1 %v1737_v6  ;;  %v675_v48 = vlaneseq  ;;  %v30_v50 = vld [vmem:[%s2775_s3] sm:$0x1] }
 0x17e   :  { %v627_v53 = vadd.f32 %v626_v51, %v625_v49  ;;  %v639_v54 = vrot.slane %v638_v52, 1  ;;  %v676_v49 = vshrl.u32 %v675_v48, 7 }
 0x180   :  { %641 = vrot.lane.b32.xlu0 %v627_v53, %s1733_s1  ;;  %v640_v55 = vadd.f32 %v639_v54, %v638_v52  ;;  %v2298_v51 = vsub.s32 0, %v676_v49 }
 0x182   :  { %644 = vrot.lane.b32.xlu1 %v640_v55, %s1733_s1 }
 0x1f2   :  { %v642_v56 = vpop.permute.xlu0 %641 }
 0x1f3   :  { %v643_v57 = vadd.f32 %v642_v56, %v627_v53  ;;  %v2303_v53 = vld [vmem:[%s2774_s2 + $0x98] sm:$0xff]  ;;  %v31_v56 = vld [vmem:[%s2776_s4] sm:$0x1] }
 0x1f4   :  { %v645_v58 = vpop.permute.xlu1 %644  ;;  %851 = vmatpush1.msra.mxu0 %v2303_v53 }
 0x1f5   :  { %v646_v59 = vadd.f32 %v645_v58, %v640_v55  ;;  %647 = vrot.lane.b32.xlu0 %v643_v57, %s1734_s16  ;;  %v2309_v55 = vld [vmem:[%s2774_s2 + $0x88] sm:$0xff]  ;;  %852 = vmatprep.subr.mxu0 %v1737_v6 }
 0x1f6   :  { %962 = vmatpush2.msra.mxu1 %v2309_v55 }
 0x1f7   :  { %650 = vrot.lane.b32.xlu1 %v646_v59, %s1734_s16  ;;  %963 = vmatprep.subr.mxu1 %v1737_v6 }
 0x267   :  { %v648_v60 = vpop.permute.xlu0 %647 }
 0x268   :  { %v649_v61 = vadd.f32 %v648_v60, %v643_v57  ;;  %v2319_v57 = vld [vmem:[%s2774_s2 + $0x90] sm:$0xff]  ;;  %v2327_v60 = vld [vmem:[%s2774_s2 + $0x80] sm:$0xff] }
 0x269   :  { %v651_v62 = vpop.permute.xlu1 %650  ;;  %853 = vmatpush1.msra.mxu0 %v2319_v57  ;;  %964 = vmatpush2.msra.mxu1 %v2327_v60 }
 0x26a   :  { %v652_v63 = vadd.f32 %v651_v62, %v646_v59  ;;  %653 = vrot.lane.b32.xlu0 %v649_v61, %s1735_s17  ;;  %882 = vmatprep.subr.mxu0 %v1737_v6  ;;  %v2335_v62 = vld [vmem:[%s2774_s2 + $0x118] sm:$0xff] }
 0x26b   :  { %1106 = vmatprep.subr.mxu1 %v1737_v6  ;;  %883 = vmatpush2.msra.mxu0 %v2335_v62 }
 0x26c   :  { %656 = vrot.lane.b32.xlu1 %v652_v63, %s1735_s17  ;;  %884 = vmatprep.subr.mxu0 %v1737_v6 }
 0x2dc   :  { %v654_v0 = vpop.permute.xlu0 %653 }
 0x2dd   :  { %v2073_v1 = vadd.f32 %v654_v0, %v649_v61 }
 0x2de   :  { %v657_v2 = vpop.permute.xlu1 %656 }
 0x2df   :  { %v2075_v4 = vadd.f32 %v657_v2, %v652_v63  ;;  %659 = vrot.lane.b32.xlu0 %v2073_v1, %s1736_s0 }
 0x2e1   :  { %662 = vrot.lane.b32.xlu1 %v2075_v4, %s1736_s0 }
 0x351   :  { %v660_v39 = vpop.permute.xlu0 %659 }
 0x352   :  { %v661_v40 = vadd.f32 %v660_v39, %v2073_v1 }
 0x353   :  { %v663_v41 = vpop.permute.xlu1 %662 }
 0x354   :  { %v665_v42 = vmul.f32 0.001953125, %v661_v40  ;;  %v664_v43 = vadd.f32 %v663_v41, %v2075_v4 }
 0x356   :  { %v667_v44 = vmul.f32 %v665_v42, %v665_v42  ;;  %v666_v45 = vmul.f32 0.001953125, %v664_v43 }
 0x358   :  { %v668_v46 = vsub.f32 %v666_v45, %v667_v44 }
 0x35a   :  { %v669_v47 = vadd.f32 1e-05, %v668_v46 }
 0x35c   :  { %1728 = vrsqrt.f32 %v669_v47 }
 0x369   :  { %v1729_v52 = vpop.eup %1728 }
 0x36a   :  { %v671_v54 = vmul.f32 %v1729_v52, %v30_v50 }
 0x36c   :  { %v672_v58 = vmul.f32 %v671_v54, %v665_v42  ;;  %v678_v59 = vrot.slane %v671_v54, %v2298_v51 }
 0x36e   :  { %v673_v61 = vsub.f32 %v31_v56, %v672_v58  ;;  %v681_v63 = vmul.f32 %v678_v59, %v2049_v28  ;;  %v680_v1 = vmul.f32 %v678_v59, %v2047_v25  ;;  %v683_v39 = vmul.f32 %v678_v59, %v2057_v35  ;;  %v2347_v28 = vld [vmem:[%s2774_s2 + $0x110] sm:$0xff] }
 0x36f   :  { %v682_v40 = vmul.f32 %v678_v59, %v2059_v36  ;;  %885 = vmatpush2.msra.mxu0 %v2347_v28 }
 0x370   :  { %v688_v0 = vrot.slane %v673_v61, %v2298_v51  ;;  %1011 = vmatprep.subr.mxu0 %v1737_v6 }
 0x372   :  { %v691_v2 = vadd.f32 %v688_v0, %v681_v63  ;;  %v690_v4 = vadd.f32 %v688_v0, %v680_v1  ;;  %v693_v43 = vadd.f32 %v688_v0, %v683_v39  ;;  %v692_v44 = vadd.f32 %v688_v0, %v682_v40 }
 0x374   :  { %v695_v41 = vmax.f32 %v691_v2, 0.0  ;;  %v694_v42 = vmax.f32 %v690_v4, 0.0  ;;  %v697_v25 = vmax.f32 %v693_v43, 0.0  ;;  %v696_v35 = vmax.f32 %v692_v44, 0.0 }
 0x376   :  { %706 = vrot.lane.b32.xlu1 %v695_v41, %s1736_s0  ;;  %704 = vrot.lane.b32.xlu0 %v694_v42, %s1736_s0 }
 0x37a   :  { %710 = vrot.lane.b32.xlu1 %v697_v25, %s1736_s0  ;;  %708 = vrot.lane.b32.xlu0 %v696_v35, %s1736_s0 }
 0x3e8   :  { %v707_v36 = vpop.permute.xlu1 %706  ;;  %v705_v45 = vpop.permute.xlu0 %704 }
 0x3e9   :  { %v718_v46 = vsel %vm716_vm10, 0.0, %v707_v36  ;;  %v722_v47 = vsel %vm716_vm10, %v707_v36, 0.0  ;;  %v717_v48 = vsel %vm716_vm10, 0.0, %v705_v45  ;;  %v721_v49 = vsel %vm716_vm10, %v705_v45, 0.0 }
 0x3ea   :  { %v731_v50 = vrot.slane %v718_v46, 7  ;;  %v729_v52 = vrot.slane %v717_v48, 7  ;;  %v733_v54 = vrot.slane %v722_v47, 7  ;;  %v730_v56 = vrot.slane %v721_v49, 7 }
 0x3ec   :  { %v2359_v58 = vpop.permute.xlu1 %710  ;;  %v709_v59 = vpop.permute.xlu0 %708  ;;  %v756_v61 = vsel %vm60_vm2, %v731_v50, 0.0  ;;  %v2363_v63 = vsel %vm60_vm2, %v729_v52, %v731_v50  ;;  %v2366_v0 = vsel %vm60_vm2, 0.0, %v729_v52  ;;  %v757_v4 = vsel %vm60_vm2, %v733_v54, 0.0 }
 0x3ed   :  { %v2370_v1 = vsel %vm716_vm10, %v2359_v58, 0.0  ;;  %v2373_v2 = vsel %vm716_vm10, 0.0, %v709_v59  ;;  %v723_v40 = vsel %vm716_vm10, %v709_v59, 0.0  ;;  %v755_v43 = vsel %vm60_vm2, 0.0, %v730_v56 }
 0x3ee   :  { %v748_v39 = vrot.slane %v2370_v1, 5  ;;  %v744_v41 = vrot.slane %v2373_v2, 5  ;;  %v745_v42 = vrot.slane %v723_v40, 5  ;;  %v805_v44 = vrot.slane %v2366_v0, 1  ;;  %1500 = vmatprep.mubr.msk.f32.mxu1 %vm817_vm11, %v755_v43  ;;  %v2427_v40 = vld [vmem:[%s2774_s2 + $0x190] sm:$0xff]  ;;  %v2573_v2 = vld [vmem:[%s2774_s2 + $0x120] sm:$0xff] }
 0x3ef   :  { %v2384_v25 = vsel %vm60_vm2, %v730_v56, %v733_v54  ;;  %v806_v35 = vrot.slane %v2363_v63, 1  ;;  %v758_v36 = vsel %vm76_vm3, %v756_v61, 0.0  ;;  %v759_v45 = vsel %vm76_vm3, %v757_v4, 0.0  ;;  %1502 = vmatmul.mubr.msk.f32.vlgmr.msra.gmra.mxu1 %vm1501_vm12, %v729_v52  ;;  %v2416_v61 = vld [vmem:[%s2774_s2 + $0x198] sm:$0xff] }
 0x3f0   :  { %v2392_v46 = vsel %vm68_vm4, %v745_v42, %v748_v39  ;;  %v2397_v47 = vsel %vm68_vm4, %v758_v36, %v744_v41  ;;  %v2400_v48 = vsel %vm68_vm4, %v759_v45, %v745_v42  ;;  %1107 = vmatpush1.msra.mxu1 %v2096_v11  ;;  %1503 = vmatprep.mubr.msk.f32.mxu1 %vm817_vm11, %v2384_v25  ;;  %v808_v49 = vrot.slane %v755_v43, 1  ;;  %v2442_v45 = vld [vmem:[%s2774_s2 + $0x188] sm:$0xff] }
 0x3f1   :  { %v809_v50 = vrot.slane %v2384_v25, 1  ;;  %1108 = vmatprep.subr.mxu1 %v1737_v6  ;;  %v807_v52 = vsel %vm101_vm6, %v805_v44, %v806_v35  ;;  %v813_v54 = vrot.slane %v2400_v48, 1  ;;  %v1093_v56 = vrot.slane %v2400_v48, 3 }
 0x3f2   :  { %1109 = vmatpush1.msra.mxu1 %v2103_v13  ;;  %v1094_v59 = vrot.slane %v2392_v46, 3  ;;  %v811_v13 = vrot.slane %v2397_v47, 1  ;;  %v998_v44 = vrot.slane %v755_v43, 2  ;;  %v999_v36 = vrot.slane %v2384_v25, 2  ;;  %v2450_v43 = vld [vmem:[%s2774_s2 + $0x180] sm:$0xff] }
 0x3f3   :  { %v810_v11 = vsel %vm101_vm6, %v808_v49, %v809_v50  ;;  %1110 = vmatprep.subr.mxu1 %v1737_v6  ;;  %971 = vmatmul.mubr.f32.gmra.mxu1 %v2363_v63  ;;  %v814_v4 = vsel %vm101_vm6, %v809_v50, %v813_v54  ;;  %v2471_v49 = vld [vmem:[%s2774_s2 + $0x170] sm:$0xff]  ;;  %v720_v50 = vsel %vm716_vm10, 0.0, %v2359_v58  ;;  %v1090_v1 = vrot.slane %v2397_v47, 3 }
 0x3f4   :  { %1498 = vmatprep.mubr.msk.f32.mxu0 %vm817_vm11, %v810_v11  ;;  %1111 = vmatpush1.msra.mxu1 %v2115_v3  ;;  %v1095_v42 = vsel %vm364_vm7, %v1093_v56, %v1094_v59  ;;  %v812_v3 = vsel %vm101_vm6, %v806_v35, %v811_v13  ;;  %v2462_v35 = vld [vmem:[%s2774_s2 + $0x178] sm:$0xff]  ;;  %v996_v56 = vrot.slane %v2363_v63, 2 }
 0x3f5   :  { %887 = vmatmul.mubr.f32.vlgmr.msra.gmra.mxu0 %v807_v52  ;;  %1112 = vmatprep.subr.mxu1 %v1737_v6  ;;  %v746_v52 = vrot.slane %v720_v50, 5 }
 0x3f6   :  { %1012 = vmatpush1.msra.mxu0 %v2416_v61  ;;  %1499 = vmatprep.mubr.msk.f32.mxu0 %vm817_vm11, %v814_v4  ;;  %v1273_v4 = vrot.slane %v2400_v48, 4 }
 0x3f7   :  { %1013 = vmatprep.subr.mxu0 %v1737_v6  ;;  %1113 = vmatpush1.msra.mxu1 %v2129_v8  ;;  %v1000_v8 = vsel %vm276_vm8, %v998_v44, %v999_v36  ;;  %v2552_v58 = vsel %vm68_vm4, %v744_v41, %v746_v52  ;;  %v2588_v54 = vsel %vm68_vm4, %v746_v52, 0.0  ;;  %v1001_v44 = vrot.slane %v2397_v47, 2 }
 0x3f8   :  { %1014 = vmatpush1.msra.mxu0 %v2427_v40  ;;  %1524 = vmatprep.mubr.msk.f32.mxu1 %vm817_vm11, %v1095_v42  ;;  %v1091_v41 = vrot.slane %v2552_v58, 3 }
 0x3f9   :  { %1015 = vmatprep.subr.mxu0 %v1737_v6  ;;  %892 = vmatmul.mubr.f32.gmra.mxu0 %v812_v3 }
 0x3fa   :  { %1016 = vmatpush1.msra.mxu0 %v2442_v45  ;;  %1114 = vmatprep.subr.mxu1 %v1737_v6  ;;  %v1092_v11 = vsel %vm364_vm7, %v1090_v1, %v1091_v41 }
 0x3fb   :  { %1017 = vmatprep.subr.mxu0 %v1737_v6  ;;  %1522 = vmatprep.mubr.msk.f32.mxu0 %vm817_vm11, %v1000_v8 }
 0x3fc   :  { %1115 = vmatpush1.msra.mxu1 %v2143_v12  ;;  %1018 = vmatpush1.msra.mxu0 %v2450_v43  ;;  %v2480_v12 = vld [vmem:[%s2774_s2 + $0x168] sm:$0xff] }
 0x3fd   :  { %1116 = vmatprep.subr.mxu1 %v1737_v6  ;;  %1019 = vmatprep.subr.mxu0 %v1737_v6 }
 0x3fe   :  { %1117 = vmatpush1.msra.mxu1 %v2157_v16  ;;  %1020 = vmatpush1.msra.mxu0 %v2462_v35  ;;  %v2489_v16 = vld [vmem:[%s2774_s2 + $0x160] sm:$0xff] }
 0x3ff   :  { %1118 = vmatprep.subr.mxu1 %v1737_v6  ;;  %1021 = vmatprep.subr.mxu0 %v1737_v6 }
 0x400   :  { %1119 = vmatpush1.msra.mxu1 %v2171_v19  ;;  %1022 = vmatpush1.msra.mxu0 %v2471_v49  ;;  %v2498_v19 = vld [vmem:[%s2774_s2 + $0x158] sm:$0xff] }
 0x401   :  { %1120 = vmatprep.subr.mxu1 %v1737_v6  ;;  %1023 = vmatprep.subr.mxu0 %v1737_v6 }
 0x402   :  { %1121 = vmatpush1.msra.mxu1 %v2185_v22  ;;  %1024 = vmatpush1.msra.mxu0 %v2480_v12  ;;  %v2507_v22 = vld [vmem:[%s2774_s2 + $0x150] sm:$0xff] }
 0x403   :  { %1122 = vmatprep.subr.mxu1 %v1737_v6  ;;  %1025 = vmatprep.subr.mxu0 %v1737_v6 }
 0x404   :  { %1123 = vmatpush1.msra.mxu1 %v2199_v23  ;;  %1026 = vmatpush1.msra.mxu0 %v2489_v16  ;;  %v2516_v23 = vld [vmem:[%s2774_s2 + $0x148] sm:$0xff] }
 0x405   :  { %1124 = vmatprep.subr.mxu1 %v1737_v6  ;;  %1027 = vmatprep.subr.mxu0 %v1737_v6 }
 0x406   :  { %1125 = vmatpush1.msra.mxu1 %v2213_v26  ;;  %1028 = vmatpush1.msra.mxu0 %v2498_v19  ;;  %v2527_v26 = vld [vmem:[%s2774_s2 + $0x140] sm:$0xff] }
 0x407   :  { %1126 = vmatprep.subr.mxu1 %v1737_v6  ;;  %1029 = vmatprep.subr.mxu0 %v1737_v6 }
 0x408   :  { %1127 = vmatpush1.msra.mxu1 %v2227_v20  ;;  %1030 = vmatpush1.msra.mxu0 %v2507_v22  ;;  %v2536_v20 = vld [vmem:[%s2774_s2 + $0x138] sm:$0xff] }
 0x409   :  { %1128 = vmatprep.subr.mxu1 %v1737_v6  ;;  %1031 = vmatprep.subr.mxu0 %v1737_v6 }
 0x40a   :  { %1129 = vmatpush1.msra.mxu1 %v2241_v30  ;;  %1032 = vmatpush1.msra.mxu0 %v2516_v23  ;;  %v2545_v30 = vld [vmem:[%s2774_s2 + $0x130] sm:$0xff] }
 0x40b   :  { %1130 = vmatprep.subr.mxu1 %v1737_v6  ;;  %1033 = vmatprep.subr.mxu0 %v1737_v6 }
 0x40c   :  { %1131 = vmatpush1.msra.mxu1 %v2255_v32  ;;  %1034 = vmatpush1.msra.mxu0 %v2527_v26  ;;  %v2559_v32 = vld [vmem:[%s2774_s2 + $0x128] sm:$0xff] }
 0x40d   :  { %1132 = vmatprep.subr.mxu1 %v1737_v6  ;;  %1035 = vmatprep.subr.mxu0 %v1737_v6 }
 0x40e   :  { %1133 = vmatpush1.msra.mxu1 %v2269_v34  ;;  %1036 = vmatpush1.msra.mxu0 %v2536_v20  ;;  %v2564_v34 = vsel %vm68_vm4, %v748_v39, 0.0  ;;  %v2585_v39 = vld [vmem:[%s2774_s2 + $0x1a8] sm:$0xff] }
 0x40f   :  { %1134 = vmatprep.subr.mxu1 %v1737_v6  ;;  %1037 = vmatprep.subr.mxu0 %v1737_v6 }
 0x410   :  { %1135 = vmatpush1.msra.mxu1 %v2303_v53  ;;  %1038 = vmatpush1.msra.mxu0 %v2545_v30  ;;  %v1098_v53 = vrot.slane %v2564_v34, 3 }
 0x411   :  { %1136 = vmatprep.subr.mxu1 %v1737_v6  ;;  %1039 = vmatprep.subr.mxu0 %v1737_v6 }
 0x412   :  { %1137 = vmatpush1.msra.mxu1 %v2319_v57  ;;  %1040 = vmatpush1.msra.mxu0 %v2559_v32  ;;  %v995_v57 = vrot.slane %v2366_v0, 2  ;;  %v1099_v63 = vsel %vm364_vm7, %v1094_v59, %v1098_v53  ;;  %v1003_v0 = vrot.slane %v2400_v48, 2  ;;  %v1274_v59 = vrot.slane %v2392_v46, 4 }
 0x413   :  { %1166 = vmatprep.subr.mxu1 %v1737_v6  ;;  %1041 = vmatprep.subr.mxu0 %v1737_v6  ;;  %v1183_v48 = vrot.slane %v2392_v46, 2 }
 0x414   :  { %1167 = vmatpush2.msra.mxu1 %v2335_v62  ;;  %1042 = vmatpush1.msra.mxu0 %v2573_v2  ;;  %v2602_v62 = vld [vmem:[%s2774_s2 + $0x1a0] sm:$0xff]  ;;  %v997_v13 = vsel %vm276_vm8, %v995_v57, %v996_v56  ;;  %v1004_v42 = vsel %vm276_vm8, %v999_v36, %v1003_v0  ;;  %v1275_v25 = vsel %vm532_vm9, %v1273_v4, %v1274_v59 }
 0x415   :  { %1168 = vmatprep.subr.mxu1 %v1737_v6  ;;  %1071 = vmatprep.subr.mxu0 %v1737_v6 }
 0x416   :  { %1169 = vmatpush2.msra.mxu1 %v2347_v28  ;;  %1072 = vmatpush2.msra.mxu0 %v2585_v39  ;;  %v1096_v28 = vrot.slane %v2588_v54, 3 }
 0x417   :  { %1171 = vmatmul.mubr.f32.vlgmr.msra.gmra.mxu1 %v1092_v11  ;;  %1286 = vmatprep.subr.mxu1 %v1737_v6 }
 0x418   :  { %1073 = vmatprep.subr.mxu0 %v1737_v6  ;;  %1525 = vmatprep.mubr.msk.f32.mxu1 %vm817_vm11, %v1099_v63 }
 0x419   :  { %1287 = vmatpush1.msra.mxu1 %v2416_v61  ;;  %1074 = vmatpush2.msra.mxu0 %v2602_v62  ;;  %v1097_v61 = vsel %vm364_vm7, %v1091_v41, %v1096_v28 }
 0x41a   :  { %1288 = vmatprep.subr.mxu1 %v1737_v6  ;;  %1076 = vmatmul.mubr.f32.vlgmr.msra.gmra.mxu0 %v997_v13 }
 0x41b   :  { %1195 = vmatprep.subr.mxu0 %v1737_v6  ;;  %1289 = vmatpush1.msra.mxu1 %v2427_v40  ;;  %v1184_v40 = vsel %vm276_vm8, %v1003_v0, %v1183_v48 }
 0x41c   :  { %1523 = vmatprep.mubr.msk.f32.mxu0 %vm817_vm11, %v1004_v42  ;;  %1176 = vmatmul.mubr.f32.gmra.mxu1 %v1097_v61 }
 0x41d   :  { %1196 = vmatpush1.msra.mxu0 %v2085_v7  ;;  %1290 = vmatprep.subr.mxu1 %v1737_v6  ;;  %v1002_v7 = vsel %vm276_vm8, %v996_v56, %v1001_v44 }
 0x41e   :  { %1197 = vmatprep.subr.mxu0 %v1737_v6  ;;  %1291 = vmatpush1.msra.mxu1 %v2442_v45 }
 0x41f   :  { %1528 = vmatprep.mubr.msk.f32.mxu1 %vm817_vm11, %v1275_v25  ;;  %1198 = vmatpush1.msra.mxu0 %v2091_v9  ;;  %v1271_v9 = vrot.slane %v2552_v58, 4 }
 0x420   :  { %1292 = vmatprep.subr.mxu1 %v1737_v6  ;;  %1081 = vmatmul.mubr.f32.gmra.mxu0 %v1002_v7 }
 0x421   :  { %1199 = vmatprep.subr.mxu0 %v1737_v6  ;;  %1293 = vmatpush1.msra.mxu1 %v2450_v43 }
 0x422   :  { %1200 = vmatpush1.msra.mxu0 %v2110_v15  ;;  %1526 = vmatprep.mubr.msk.f32.mxu0 %vm817_vm11, %v1184_v40  ;;  %v1270_v15 = vrot.slane %v2397_v47, 4 }
 0x423   :  { %1294 = vmatprep.subr.mxu1 %v1737_v6  ;;  %1201 = vmatprep.subr.mxu0 %v1737_v6 }
 0x424   :  { %1295 = vmatpush1.msra.mxu1 %v2462_v35  ;;  %1202 = vmatpush1.msra.mxu0 %v2124_v5  ;;  %v1278_v5 = vrot.slane %v2564_v34, 4 }
 0x425   :  { %1296 = vmatprep.subr.mxu1 %v1737_v6  ;;  %1203 = vmatprep.subr.mxu0 %v1737_v6 }
 0x426   :  { %1297 = vmatpush1.msra.mxu1 %v2471_v49  ;;  %1204 = vmatpush1.msra.mxu0 %v2138_v10  ;;  %v1181_v10 = vrot.slane %v2552_v58, 2 }
 0x427   :  { %1298 = vmatprep.subr.mxu1 %v1737_v6  ;;  %1205 = vmatprep.subr.mxu0 %v1737_v6 }
 0x428   :  { %1299 = vmatpush1.msra.mxu1 %v2480_v12  ;;  %1206 = vmatpush1.msra.mxu0 %v2152_v14  ;;  %v1187_v14 = vrot.slane %v2564_v34, 2 }
 0x429   :  { %1300 = vmatprep.subr.mxu1 %v1737_v6  ;;  %1207 = vmatprep.subr.mxu0 %v1737_v6 }
 0x42a   :  { %1301 = vmatpush1.msra.mxu1 %v2489_v16  ;;  %1208 = vmatpush1.msra.mxu0 %v2166_v17  ;;  %v1272_v17 = vsel %vm532_vm9, %v1270_v15, %v1271_v9 }
 0x42b   :  { %1302 = vmatprep.subr.mxu1 %v1737_v6  ;;  %1209 = vmatprep.subr.mxu0 %v1737_v6 }
 0x42c   :  { %1303 = vmatpush1.msra.mxu1 %v2498_v19  ;;  %1210 = vmatpush1.msra.mxu0 %v2180_v21  ;;  %v1276_v21 = vrot.slane %v2588_v54, 4 }
 0x42d   :  { %1304 = vmatprep.subr.mxu1 %v1737_v6  ;;  %1211 = vmatprep.subr.mxu0 %v1737_v6 }
 0x42e   :  { %1305 = vmatpush1.msra.mxu1 %v2507_v22  ;;  %1212 = vmatpush1.msra.mxu0 %v2194_v18  ;;  %v1279_v18 = vsel %vm532_vm9, %v1274_v59, %v1278_v5 }
 0x42f   :  { %1306 = vmatprep.subr.mxu1 %v1737_v6  ;;  %1213 = vmatprep.subr.mxu0 %v1737_v6 }
 0x430   :  { %1307 = vmatpush1.msra.mxu1 %v2516_v23  ;;  %1214 = vmatpush1.msra.mxu0 %v2208_v24  ;;  %v1182_v24 = vsel %vm276_vm8, %v1001_v44, %v1181_v10 }
 0x431   :  { %1308 = vmatprep.subr.mxu1 %v1737_v6  ;;  %1215 = vmatprep.subr.mxu0 %v1737_v6 }
 0x432   :  { %1309 = vmatpush1.msra.mxu1 %v2527_v26  ;;  %1216 = vmatpush1.msra.mxu0 %v2222_v27  ;;  %v1185_v27 = vrot.slane %v2588_v54, 2 }
 0x433   :  { %1310 = vmatprep.subr.mxu1 %v1737_v6  ;;  %1217 = vmatprep.subr.mxu0 %v1737_v6 }
 0x434   :  { %1311 = vmatpush1.msra.mxu1 %v2536_v20  ;;  %1218 = vmatpush1.msra.mxu0 %v2236_v29  ;;  %v1188_v29 = vsel %vm276_vm8, %v1183_v48, %v1187_v14 }
 0x435   :  { %1312 = vmatprep.subr.mxu1 %v1737_v6  ;;  %1219 = vmatprep.subr.mxu0 %v1737_v6 }
 0x436   :  { %1313 = vmatpush1.msra.mxu1 %v2545_v30  ;;  %1220 = vmatpush1.msra.mxu0 %v2250_v31  ;;  %v1186_v31 = vsel %vm276_vm8, %v1181_v10, %v1185_v27 }
 0x437   :  { %1314 = vmatprep.subr.mxu1 %v1737_v6  ;;  %1221 = vmatprep.subr.mxu0 %v1737_v6 }
 0x438   :  { %1315 = vmatpush1.msra.mxu1 %v2559_v32  ;;  %1222 = vmatpush1.msra.mxu0 %v2264_v33 }
 0x439   :  { %1316 = vmatprep.subr.mxu1 %v1737_v6  ;;  %1223 = vmatprep.subr.mxu0 %v1737_v6 }
 0x43a   :  { %1317 = vmatpush1.msra.mxu1 %v2573_v2  ;;  %1224 = vmatpush1.msra.mxu0 %v2278_v37 }
 0x43b   :  { %1346 = vmatprep.subr.mxu1 %v1737_v6  ;;  %1225 = vmatprep.subr.mxu0 %v1737_v6 }
 0x43c   :  { %1347 = vmatpush2.msra.mxu1 %v2585_v39  ;;  %1226 = vmatpush1.msra.mxu0 %v2287_v38 }
 0x43d   :  { %1348 = vmatprep.subr.mxu1 %v1737_v6  ;;  %1255 = vmatprep.subr.mxu0 %v1737_v6 }
 0x43e   :  { %1349 = vmatpush2.msra.mxu1 %v2602_v62  ;;  %1256 = vmatpush2.msra.mxu0 %v2309_v55 }
 0x43f   :  { %1351 = vmatmul.mubr.f32.vlgmr.msra.gmra.mxu1 %v1272_v17  ;;  %1257 = vmatprep.subr.mxu0 %v1737_v6  ;;  %v1277_v6 = vsel %vm532_vm9, %v1271_v9, %v1276_v21 }
 0x440   :  { %1529 = vmatprep.mubr.msk.f32.mxu1 %vm817_vm11, %v1279_v18  ;;  %1258 = vmatpush2.msra.mxu0 %v2327_v60 }
 0x441   :  { %1260 = vmatmul.mubr.f32.vlgmr.msra.gmra.mxu0 %v1182_v24 }
 0x442   :  { %1527 = vmatprep.mubr.msk.f32.mxu0 %vm817_vm11, %v1188_v29 }
 0x443   :  { %1356 = vmatmul.mubr.f32.gmra.mxu1 %v1277_v6 }
 0x445   :  { %1265 = vmatmul.mubr.f32.gmra.mxu0 %v1186_v31 }
 0x4af   :  { %v967_v33 = vpop.f32.mrf.mxu1 }
 0x4b1   :  { %v969_v37 = vpop.f32.mrf.mxu1 }
 0x4b3   :  { %v972_v38 = vpop.f32.mrf.mxu1 }
 0x4b5   :  { %v888_v55 = vpop.f32.mrf.mxu0  ;;  %v974_v60 = vpop.f32.mrf.mxu1 }
 0x4b6   :  { %v968_v47 = vadd.f32 %v967_v33, %v888_v55 }
 0x4b7   :  { %v890_v36 = vpop.f32.mrf.mxu0 }
 0x4b9   :  { %v893_v3 = vpop.f32.mrf.mxu0 }
 0x4ba   :  { %v973_v45 = vadd.f32 %v972_v38, %v893_v3 }
 0x4bb   :  { %v895_v46 = vpop.f32.mrf.mxu0 }
 0x4d7   :  { %v1172_v43 = vpop.f32.mrf.mxu1 }
 0x4d9   :  { %v1174_v8 = vpop.f32.mrf.mxu1 }
 0x4da   :  { %v1077_v35 = vpop.f32.mrf.mxu0 }
 0x4db   :  { %v2728_v20 = vadd.f32 %v1077_v35, %v968_v47  ;;  %v698_v35 = vld [vmem:[%s2777_s5] sm:$0x1] }
 0x4dc   :  { %v1177_v49 = vpop.f32.mrf.mxu1  ;;  %v1079_v12 = vpop.f32.mrf.mxu0 }
 0x4dd   :  { %v1372_v53 = vmul.f32 %v2728_v20, %v2728_v20 }
 0x4de   :  { %v1179_v16 = vpop.f32.mrf.mxu1 }
 0x4df   :  { %v699_v16 = vld [vmem:[%s2778_s6] sm:$0x1] }
 0x4e0   :  { %v1082_v19 = vpop.f32.mrf.mxu0 }
 0x4e1   :  { %v2726_v50 = vadd.f32 %v1082_v19, %v973_v45 }
 0x4e2   :  { %v1084_v22 = vpop.f32.mrf.mxu0 }
 0x4e3   :  { %v1373_v34 = vmul.f32 %v2726_v50, %v2726_v50  ;;  %v1363_v39 = vadd.f32 %v2726_v50, %v2728_v20 }
 0x4e5   :  { %v1376_v11 = vadd.f32 %v1373_v34, %v1372_v53 }
 0x4ff   :  { %v1352_v23 = vpop.f32.mrf.mxu1 }
 0x501   :  { %v1354_v26 = vpop.f32.mrf.mxu1  ;;  %v1261_v52 = vpop.f32.mrf.mxu0 }
 0x502   :  { %v1262_v30 = vadd.f32 %v1261_v52, %v1172_v43 }
 0x503   :  { %v1357_v58 = vpop.f32.mrf.mxu1  ;;  %v1263_v32 = vpop.f32.mrf.mxu0 }
 0x504   :  { %v2732_v2 = vadd.f32 %v1352_v23, %v1262_v30 }
 0x505   :  { %v1359_v41 = vpop.f32.mrf.mxu1  ;;  %v1266_v1 = vpop.f32.mrf.mxu0 }
 0x506   :  { %v1374_v54 = vmul.f32 %v2732_v2, %v2732_v2  ;;  %v1267_v57 = vadd.f32 %v1266_v1, %v1177_v49  ;;  %v1364_v62 = vadd.f32 %v1363_v39, %v2732_v2 }
 0x507   :  { %v1268_v56 = vpop.f32.mrf.mxu0 }
 0x508   :  { %v1362_v63 = vadd.f32 %v1357_v58, %v1267_v57  ;;  %v1377_v0 = vadd.f32 %v1376_v11, %v1374_v54 }
 0x50a   :  { %v1365_v28 = vadd.f32 %v1364_v62, %v1362_v63  ;;  %v1375_v13 = vmul.f32 %v1362_v63, %v1362_v63 }
 0x50c   :  { %v1366_v4 = vrot.slane %v1365_v28, 4  ;;  %v1378_v59 = vadd.f32 %v1377_v0, %v1375_v13 }
 0x50e   :  { %v1367_v42 = vadd.f32 %v1366_v4, %v1365_v28  ;;  %v1379_v61 = vrot.slane %v1378_v59, 4 }
 0x510   :  { %v1368_v44 = vrot.slane %v1367_v42, 2  ;;  %v1380_v48 = vadd.f32 %v1379_v61, %v1378_v59 }
 0x512   :  { %v1369_v25 = vadd.f32 %v1368_v44, %v1367_v42  ;;  %v1381_v7 = vrot.slane %v1380_v48, 2 }
 0x514   :  { %v1370_v40 = vrot.slane %v1369_v25, 1  ;;  %v1382_v9 = vadd.f32 %v1381_v7, %v1380_v48 }
 0x516   :  { %v1371_v15 = vadd.f32 %v1370_v40, %v1369_v25  ;;  %v1383_v5 = vrot.slane %v1382_v9, 1 }
 0x518   :  { %1385 = vrot.lane.b32.xlu0 %v1371_v15, %s1733_s1  ;;  %v1384_v10 = vadd.f32 %v1383_v5, %v1382_v9 }
 0x51a   :  { %1388 = vrot.lane.b32.xlu1 %v1384_v10, %s1733_s1 }
 0x58a   :  { %v1386_v14 = vpop.permute.xlu0 %1385 }
 0x58b   :  { %v1387_v17 = vadd.f32 %v1386_v14, %v1371_v15 }
 0x58c   :  { %v1389_v21 = vpop.permute.xlu1 %1388 }
 0x58d   :  { %v1390_v18 = vadd.f32 %v1389_v21, %v1384_v10  ;;  %1391 = vrot.lane.b32.xlu0 %v1387_v17, %s1734_s16 }
 0x58f   :  { %1394 = vrot.lane.b32.xlu1 %v1390_v18, %s1734_s16 }
 0x5ff   :  { %v1392_v24 = vpop.permute.xlu0 %1391 }
 0x600   :  { %v1393_v27 = vadd.f32 %v1392_v24, %v1387_v17 }
 0x601   :  { %v1395_v29 = vpop.permute.xlu1 %1394 }
 0x602   :  { %v1396_v6 = vadd.f32 %v1395_v29, %v1390_v18  ;;  %1397 = vrot.lane.b32.xlu0 %v1393_v27, %s1735_s17 }
 0x604   :  { %1400 = vrot.lane.b32.xlu1 %v1396_v6, %s1735_s17 }
 0x674   :  { %v1398_v31 = vpop.permute.xlu0 %1397 }
 0x675   :  { %v1399_v33 = vadd.f32 %v1398_v31, %v1393_v27 }
 0x676   :  { %v1401_v37 = vpop.permute.xlu1 %1400 }
 0x677   :  { %v1402_v38 = vadd.f32 %v1401_v37, %v1396_v6  ;;  %1403 = vrot.lane.b32.xlu0 %v1399_v33, %s1736_s0 }
 0x679   :  { %1406 = vrot.lane.b32.xlu1 %v1402_v38, %s1736_s0 }
 0x6e9   :  { %v1404_v55 = vpop.permute.xlu0 %1403 }
 0x6ea   :  { %v1405_v60 = vadd.f32 %v1404_v55, %v1399_v33 }
 0x6eb   :  { %v1407_v47 = vpop.permute.xlu1 %1406 }
 0x6ec   :  { %v1409_v36 = vmul.f32 0.001953125, %v1405_v60  ;;  %v1408_v3 = vadd.f32 %v1407_v47, %v1402_v38 }
 0x6ee   :  { %v1411_v45 = vmul.f32 %v1409_v36, %v1409_v36  ;;  %v1410_v46 = vmul.f32 0.001953125, %v1408_v3 }
 0x6f0   :  { %v1412_v43 = vsub.f32 %v1410_v46, %v1411_v45 }
 0x6f2   :  { %v1413_v8 = vadd.f32 1e-05, %v1412_v43 }
 0x6f4   :  { %1730 = vrsqrt.f32 %v1413_v8 }
 0x701   :  { %v1731_v49 = vpop.eup %1730 }
 0x702   :  { %v1415_v12 = vmul.f32 %v1731_v49, %v698_v35 }
 0x704   :  { %v1416_v19 = vmul.f32 %v1415_v12, %v1409_v36  ;;  %v1422_v22 = vrot.slane %v1415_v12, %v2298_v51 }
 0x706   :  { %v1417_v23 = vsub.f32 %v699_v16, %v1416_v19  ;;  %v1424_v26 = vmul.f32 %v1422_v22, %v2728_v20  ;;  %v1425_v52 = vmul.f32 %v1422_v22, %v2726_v50  ;;  %v1426_v30 = vmul.f32 %v1422_v22, %v2732_v2 }
 0x707   :  { %v1427_v58 = vmul.f32 %v1422_v22, %v1362_v63 }
 0x708   :  { %v1432_v32 = vrot.slane %v1417_v23, %v2298_v51 }
 0x70a   :  { %v1434_v34 = vadd.f32 %v1432_v32, %v1424_v26  ;;  %v1435_v41 = vadd.f32 %v1432_v32, %v1425_v52  ;;  %v1436_v1 = vadd.f32 %v1432_v32, %v1426_v30  ;;  %v1437_v53 = vadd.f32 %v1432_v32, %v1427_v58 }
 0x70c   :  { %v1438_v39 = vmax.f32 %v1434_v34, 0.0  ;;  %v1439_v54 = vmax.f32 %v1435_v41, 0.0  ;;  %v1440_v57 = vmax.f32 %v1436_v1, 0.0  ;;  %v1441_v56 = vmax.f32 %v1437_v53, 0.0 }
 0x70e   :  { %1442 = vst [vmem:[%s2779_s7] sm:$0xff] %v1438_v39  ;;  %1443 = vst [vmem:[%s2779_s7 + $0x8] sm:$0xff] %v1439_v54 }
 0x70f   :  { %1444 = vst [vmem:[%s2779_s7 + $0x10] sm:$0xff] %v1440_v57  ;;  %1445 = vst [vmem:[%s2779_s7 + $0x18] sm:$0xff] %v1441_v56 }

</bundles_post_ra>
